<compile_context>
chip_gen: v5e
topology: v5e:2x2
jax: 0.10.0
libtpu: 0.0.40
codegen_flags: <defaults>
</compile_context>

<pallas_src>
import jax
import jax.numpy as jnp
from jax.experimental import pallas as pl
from jax.experimental.pallas import tpu as pltpu

LANE = 128


def _shifted_softplus(x):
    # ShiftedSoftplus: log(exp(x) + 1) - log(2)
    return jax.nn.softplus(x) - jnp.log(2.0).astype(x.dtype)


def _round_up(v, m):
    return (v + m - 1) // m * m


def _pad2(a, shape, dtype=None):
    out = jnp.pad(a, [(0, shape[0] - a.shape[0]), (0, shape[1] - a.shape[1])])
    return out if dtype is None else out.astype(dtype)


def schnet_interaction_kernel(
    xf_ref,       # [N, NF_pad] bf16      precomputed x @ W_in (gather source)
    idx_i_ref,    # [1, TP] int32         receiving atom per pair (lane-dense)
    idx_j_ref,    # [TP, 1] int32         neighbor atom per pair (sublane)
    f_ij_ref,     # [TP, RBF_pad] bf16    radial basis tile
    cut_ref,      # [TP, 1] f32           cosine cutoff tile
    w_f1_ref, b_f1_ref,   # [RBF_pad, NF_pad] bf16, [1, NF_pad] f32   filter_network[0]
    w_f2_ref, b_f2_ref,   # [NF_pad, NF_pad] bf16,  [1, NF_pad] f32   filter_network[1]
    w_o1_ref, b_o1_ref,   # [NF_pad, F_pad] bf16,   [1, F_pad] f32    feature_to_output[0]
    w_o2_ref, b_o2_ref,   # [F_pad, F_pad] bf16,    [1, F_pad] f32    feature_to_output[1]
    out_ref,      # [N, F_pad]
    agg_ref,      # VMEM scratch [N, NF_pad] f32   scatter_add accumulator
    iota_g_ref,   # VMEM scratch [TP, N] i32       atom ids along lanes (gather mask)
    iota_s_ref,   # VMEM scratch [N, TP] i32       atom ids along sublanes (scatter mask)
):
    f32 = jnp.float32
    bf16 = jnp.bfloat16
    pid = pl.program_id(0)
    n_atoms = xf_ref.shape[0]
    tp = f_ij_ref.shape[0]

    # --- step 0: zero the accumulator, build the shape-only iota masks once --
    @pl.when(pid == 0)
    def _init():
        agg_ref[...] = jnp.zeros_like(agg_ref)
        iota_g_ref[...] = jax.lax.broadcasted_iota(jnp.int32, (tp, n_atoms), 1)
        iota_s_ref[...] = jax.lax.broadcasted_iota(jnp.int32, (n_atoms, tp), 0)

    # --- filter network on this pair tile (bf16 MXU, f32 elementwise) --------
    h = jnp.dot(f_ij_ref[...], w_f1_ref[...],
                preferred_element_type=f32) + b_f1_ref[...]
    h = _shifted_softplus(h)
    w_ij = jnp.dot(h.astype(bf16), w_f2_ref[...],
                   preferred_element_type=f32) + b_f2_ref[...]
    w_ij = w_ij * cut_ref[...]                                      # [TP, NF_pad]

    # --- gather x_j = xf[idx_j]: one-hot [TP, N] bf16 matmul (MXU) -----------
    # TODO(synk): replace with a scalar-prefetch / DMA row gather for large
    # atom counts (N >~ 2k); the O(TP*N) mask is near-free at small N.
    onehot_j = (idx_j_ref[...] == iota_g_ref[...]).astype(bf16)     # [TP, N]
    x_j = jnp.dot(onehot_j, xf_ref[...], preferred_element_type=f32)
    x_ij = x_j * w_ij                                               # [TP, NF_pad]

    # --- scatter-add over idx_i: one-hot built directly in [N, TP] layout ----
    onehot_i = (idx_i_ref[...] == iota_s_ref[...]).astype(bf16)     # [N, TP]
    agg_ref[...] += jnp.dot(onehot_i, x_ij.astype(bf16),
                            preferred_element_type=f32)             # [N, NF_pad]

    # --- last step: feature_to_output head, single lane-dense store ----------
    @pl.when(pid == pl.num_programs(0) - 1)
    def _finalize():
        h2 = jnp.dot(agg_ref[...].astype(bf16), w_o1_ref[...],
                     preferred_element_type=f32) + b_o1_ref[...]
        h2 = _shifted_softplus(h2)
        y = jnp.dot(h2.astype(bf16), w_o2_ref[...],
                    preferred_element_type=f32) + b_o2_ref[...]
        out_ref[...] = y.astype(out_ref.dtype)


def schnet_interaction(x, pairlist, f_ij, f_ij_cutoff, params, *, tile_pairs=256):
    """Pad to lane-dense shapes, tile the pair axis, call the fused kernel."""
    N, F_atom = x.shape
    P, n_rbf = f_ij.shape
    n_filters = params["w_in"].shape[1]
    bf16 = jnp.bfloat16

    # TODO(synk): when n_filters << 128 (as in the demo), pack several pair
    # tiles side-by-side along the lane axis instead of padding 16 -> 128.
    F_pad = _round_up(F_atom, LANE)
    NF_pad = _round_up(n_filters, LANE)
    RBF_pad = _round_up(n_rbf, LANE)
    P_pad = _round_up(P, tile_pairs)
    num_tiles = P_pad // tile_pairs

    # --- xf = x @ W_in precomputed in the wrapper (bf16 MXU, f32 accumulate) -
    xf = jnp.dot(x.astype(bf16), params["w_in"].astype(bf16),
                 preferred_element_type=jnp.float32)
    xf_p = _pad2(xf, (N, NF_pad), bf16)

    # --- operand prep (zero padding is exact; see header comment) ------------
    f_ij_p = _pad2(f_ij, (P_pad, RBF_pad), bf16)
    cut_p = _pad2(f_ij_cutoff, (P_pad, 1))          # padded pairs: cutoff = 0

    idx_i = pairlist[0].astype(jnp.int32)
    idx_j = pairlist[1].astype(jnp.int32)
    # padded pairs: out-of-range index N -> all-zero one-hot rows/cols
    idx_i_p = jnp.full((1, P_pad), N, jnp.int32).at[0, :P].set(idx_i)
    idx_j_p = jnp.full((P_pad, 1), N, jnp.int32).at[:P, 0].set(idx_j)

    w_f1 = _pad2(params["w_f1"], (RBF_pad, NF_pad), bf16)
    b_f1 = _pad2(params["b_f1"], (1, NF_pad))
    w_f2 = _pad2(params["w_f2"], (NF_pad, NF_pad), bf16)
    b_f2 = _pad2(params["b_f2"], (1, NF_pad))
    w_o1 = _pad2(params["w_o1"], (NF_pad, F_pad), bf16)
    b_o1 = _pad2(params["b_o1"], (1, F_pad))
    w_o2 = _pad2(params["w_o2"], (F_pad, F_pad), bf16)
    b_o2 = _pad2(params["b_o2"], (1, F_pad))

    def const_map(i):
        return (0, 0)

    def pair_row_map(i):
        return (i, 0)

    def pair_lane_map(i):
        return (0, i)

    in_specs = [
        pl.BlockSpec((N, NF_pad), const_map),                # xf (bf16, resident)
        pl.BlockSpec((1, tile_pairs), pair_lane_map),        # idx_i  [1, P_pad]
        pl.BlockSpec((tile_pairs, 1), pair_row_map),         # idx_j  [P_pad, 1]
        pl.BlockSpec((tile_pairs, RBF_pad), pair_row_map),   # f_ij (bf16)
        pl.BlockSpec((tile_pairs, 1), pair_row_map),         # f_ij_cutoff
        # TODO(synk): pipeline_mode=pl.Buffered(1) on the constant weight specs
        # would halve their VMEM cost on v7x for wide feature dims.
        pl.BlockSpec((RBF_pad, NF_pad), const_map),          # w_f1
        pl.BlockSpec((1, NF_pad), const_map),                # b_f1
        pl.BlockSpec((NF_pad, NF_pad), const_map),           # w_f2
        pl.BlockSpec((1, NF_pad), const_map),                # b_f2
        pl.BlockSpec((NF_pad, F_pad), const_map),            # w_o1
        pl.BlockSpec((1, F_pad), const_map),                 # b_o1
        pl.BlockSpec((F_pad, F_pad), const_map),             # w_o2
        pl.BlockSpec((1, F_pad), const_map),                 # b_o2
    ]
    out_specs = pl.BlockSpec((N, F_pad), const_map)

    # --- explicit VMEM budget (v5e scoped default is 16 MiB; v7x phys 64 MiB)
    def _b(shape, itemsize):
        n = 1
        for s in shape:
            n *= s
        return n * itemsize

    vmem_est = 0
    # double-buffered pair-tile inputs
    vmem_est += 2 * (_b((1, tile_pairs), 4) + _b((tile_pairs, 1), 4)
                     + _b((tile_pairs, RBF_pad), 2) + _b((tile_pairs, 1), 4))
    # constant-index inputs (still double-buffered by default)
    vmem_est += 2 * (_b((N, NF_pad), 2)
                     + _b((RBF_pad, NF_pad), 2) + _b((NF_pad, NF_pad), 2)
                     + _b((NF_pad, F_pad), 2) + _b((F_pad, F_pad), 2)
                     + 2 * _b((1, NF_pad), 4) + 2 * _b((1, F_pad), 4))
    # output
    vmem_est += 2 * _b((N, F_pad), 4)
    # scratches: agg accumulator + hoisted iota masks (lane/sublane padded)
    vmem_est += _b((N, NF_pad), 4)
    vmem_est += _b((tile_pairs, _round_up(N, LANE)), 4)
    vmem_est += _b((_round_up(N, 8), tile_pairs), 4)
    vmem_limit = int(min(max(2 * vmem_est, 32 << 20), 64 << 20))

    # TODO(synk): on v7x, split pair tiles across the 2 TensorCores (leading
    # parallel grid axis / pl.core_map) with per-core partial agg, then add the
    # partials before the feature_to_output head.
    out_padded = pl.pallas_call(
        schnet_interaction_kernel,
        grid=(num_tiles,),
        in_specs=in_specs,
        out_specs=out_specs,
        out_shape=jax.ShapeDtypeStruct((N, F_pad), x.dtype),
        scratch_shapes=[
            pltpu.VMEM((N, NF_pad), jnp.float32),        # agg accumulator
            pltpu.VMEM((tile_pairs, N), jnp.int32),      # iota for gather mask
            pltpu.VMEM((N, tile_pairs), jnp.int32),      # iota for scatter mask
        ],
        compiler_params=pltpu.CompilerParams(
            dimension_semantics=("arbitrary",),          # agg accumulates over tiles
            vmem_limit_bytes=vmem_limit,
        ),
    )(xf_p, idx_i_p, idx_j_p, f_ij_p, cut_p,
      w_f1, b_f1, w_f2, b_f2, w_o1, b_o1, w_o2, b_o2)

    return out_padded[:, :F_atom]


def _reference(x, pairlist, f_ij, f_ij_cutoff, params):
    """Pure-JAX (f32) reference mirroring the PyTorch forward."""
    idx_i, idx_j = pairlist[0], pairlist[1]
    xf = x @ params["w_in"]
    h = _shifted_softplus(f_ij @ params["w_f1"] + params["b_f1"])
    w_ij = (h @ params["w_f2"] + params["b_f2"]) * f_ij_cutoff
    x_ij = xf[idx_j] * w_ij
    agg = jnp.zeros_like(xf).at[idx_i].add(x_ij)
    h2 = _shifted_softplus(agg @ params["w_o1"] + params["b_o1"])
    return h2 @ params["w_o2"] + params["b_o2"]


def _init_params(key, n_atom_basis, n_filters, n_rbf):
    ks = jax.random.split(key, 9)

    def w(k, shape):
        return jax.random.normal(k, shape, jnp.float32) / jnp.sqrt(shape[0])

    return {
        "w_in": w(ks[0], (n_atom_basis, n_filters)),
        "w_f1": w(ks[1], (n_rbf, n_filters)),
        "b_f1": 0.01 * jax.random.normal(ks[2], (1, n_filters), jnp.float32),
        "w_f2": w(ks[3], (n_filters, n_filters)),
        "b_f2": 0.01 * jax.random.normal(ks[4], (1, n_filters), jnp.float32),
        "w_o1": w(ks[5], (n_filters, n_atom_basis)),
        "b_o1": 0.01 * jax.random.normal(ks[6], (1, n_atom_basis), jnp.float32),
        "w_o2": w(ks[7], (n_atom_basis, n_atom_basis)),
        "b_o2": 0.01 * jax.random.normal(ks[8], (1, n_atom_basis), jnp.float32),
    }


if __name__ == "__main__":
    # Small shapes consistent with the module's asserts:
    #   number_of_per_atom_features > 10, number_of_filters > 1, n_rbf > 4
    N_ATOMS = 8
    N_PAIRS = 300      # > tile_pairs so the grid accumulation path is exercised
    F_ATOM = 32        # number_of_per_atom_features
    N_FILTERS = 16     # number_of_filters
    N_RBF = 16         # number_of_radial_basis_functions

    key = jax.random.PRNGKey(0)
    k_x, k_pair, k_rbf, k_cut, k_par = jax.random.split(key, 5)

    x = jax.random.normal(k_x, (N_ATOMS, F_ATOM), jnp.float32)
    pairlist = jax.random.randint(k_pair, (2, N_PAIRS), 0, N_ATOMS, jnp.int32)
    f_ij = jax.random.uniform(k_rbf, (N_PAIRS, N_RBF), jnp.float32)
    f_ij_cutoff = jax.random.uniform(k_cut, (N_PAIRS, 1), jnp.float32)
    params = _init_params(k_par, F_ATOM, N_FILTERS, N_RBF)

    out = schnet_interaction(x, pairlist, f_ij, f_ij_cutoff, params, tile_pairs=256)
    out = jax.block_until_ready(out)

    ref = _reference(x, pairlist, f_ij, f_ij_cutoff, params)
    assert out.shape == (N_ATOMS, F_ATOM)
    # The whole chain (xf, filter network, gather/scatter masks, head) now runs
    # bf16 on the MXU with f32 accumulation, so ~5 chained matmuls accumulate
    # roughly bf16_eps * sqrt(K) relative error each vs the f32 reference;
    # compare with a correspondingly relaxed tolerance.
    assert jnp.allclose(out, ref, atol=8e-2, rtol=8e-2), (
        f"mismatch vs reference, max abs err = {float(jnp.max(jnp.abs(out - ref)))}"
    )

    print("KERNEL_OK")
</pallas_src>

<mosaic_0001>
module attributes {stable_mosaic.version = 11 : i64} {
  func.func @schnet_interaction_kernel(%arg0: i32, %arg1: memref<8x128xbf16, #tpu.memory_space<vmem>>, %arg2: memref<1x256xi32, #tpu.memory_space<vmem>>, %arg3: memref<256x1xi32, #tpu.memory_space<vmem>>, %arg4: memref<256x128xbf16, #tpu.memory_space<vmem>>, %arg5: memref<256x1xf32, #tpu.memory_space<vmem>>, %arg6: memref<128x128xbf16, #tpu.memory_space<vmem>>, %arg7: memref<1x128xf32, #tpu.memory_space<vmem>>, %arg8: memref<128x128xbf16, #tpu.memory_space<vmem>>, %arg9: memref<1x128xf32, #tpu.memory_space<vmem>>, %arg10: memref<128x128xbf16, #tpu.memory_space<vmem>>, %arg11: memref<1x128xf32, #tpu.memory_space<vmem>>, %arg12: memref<128x128xbf16, #tpu.memory_space<vmem>>, %arg13: memref<1x128xf32, #tpu.memory_space<vmem>>, %arg14: memref<8x128xf32, #tpu.memory_space<vmem>>, %arg15: memref<8x128xf32, #tpu.memory_space<vmem>>, %arg16: memref<256x8xi32, #tpu.memory_space<vmem>>, %arg17: memref<8x256xi32, #tpu.memory_space<vmem>>) attributes {dimension_semantics = [#tpu.dimension_semantics<arbitrary>], iteration_bounds = array<i64: 2>, scalar_prefetch = 0 : i64, scratch_operands = 3 : i64, tpu.core_type = #tpu.core_type<tc>, window_params = [{pipeline_mode = #tpu.pipeline_mode<synchronous>, transform_indices = @transform_0, window_bounds = array<i64: 8, 128>}, {transform_indices = @transform_1, window_bounds = array<i64: 1, 256>}, {transform_indices = @transform_2, window_bounds = array<i64: 256, 1>}, {transform_indices = @transform_3, window_bounds = array<i64: 256, 128>}, {transform_indices = @transform_4, window_bounds = array<i64: 256, 1>}, {pipeline_mode = #tpu.pipeline_mode<synchronous>, transform_indices = @transform_5, window_bounds = array<i64: 128, 128>}, {pipeline_mode = #tpu.pipeline_mode<synchronous>, transform_indices = @transform_6, window_bounds = array<i64: 1, 128>}, {pipeline_mode = #tpu.pipeline_mode<synchronous>, transform_indices = @transform_7, window_bounds = array<i64: 128, 128>}, {pipeline_mode = #tpu.pipeline_mode<synchronous>, transform_indices = @transform_8, window_bounds = array<i64: 1, 128>}, {pipeline_mode = #tpu.pipeline_mode<synchronous>, transform_indices = @transform_9, window_bounds = array<i64: 128, 128>}, {pipeline_mode = #tpu.pipeline_mode<synchronous>, transform_indices = @transform_10, window_bounds = array<i64: 1, 128>}, {pipeline_mode = #tpu.pipeline_mode<synchronous>, transform_indices = @transform_11, window_bounds = array<i64: 128, 128>}, {pipeline_mode = #tpu.pipeline_mode<synchronous>, transform_indices = @transform_12, window_bounds = array<i64: 1, 128>}, {pipeline_mode = #tpu.pipeline_mode<synchronous>, transform_indices = @transform_13, window_bounds = array<i64: 8, 128>}]} {
    %c0_i32 = arith.constant 0 : i32
    %0 = arith.cmpi eq, %arg0, %c0_i32 : i32
    %1 = arith.extui %0 : i1 to i32
    %c0_i32_0 = arith.constant 0 : i32
    %2 = arith.cmpi ne, %1, %c0_i32_0 : i32
    scf.if %2 {
      %cst_33 = arith.constant 0.000000e+00 : f32
      %60 = vector.broadcast %cst_33 : f32 to vector<8x128xf32>
      %c0_34 = arith.constant 0 : index
      %c0_35 = arith.constant 0 : index
      %61 = vector.load %arg15[%c0_34, %c0_35] : memref<8x128xf32, #tpu.memory_space<vmem>>, vector<8x128xf32>
      tpu.vector_store %arg15[%c0_34, %c0_35], %60 {strides = array<i32>} : memref<8x128xf32, #tpu.memory_space<vmem>>, vector<8x128xf32>,
      %62 = tpu.iota {dimensions = array<i32: 1>} : vector<256x8xi32>
      %c0_36 = arith.constant 0 : index
      %c0_37 = arith.constant 0 : index
      %63 = vector.load %arg16[%c0_36, %c0_37] : memref<256x8xi32, #tpu.memory_space<vmem>>, vector<256x8xi32>
      tpu.vector_store %arg16[%c0_36, %c0_37], %62 {strides = array<i32>} : memref<256x8xi32, #tpu.memory_space<vmem>>, vector<256x8xi32>,
      %64 = tpu.iota {dimensions = array<i32: 0>} : vector<8x256xi32>
      %c0_38 = arith.constant 0 : index
      %c0_39 = arith.constant 0 : index
      %65 = vector.load %arg17[%c0_38, %c0_39] : memref<8x256xi32, #tpu.memory_space<vmem>>, vector<8x256xi32>
      tpu.vector_store %arg17[%c0_38, %c0_39], %64 {strides = array<i32>} : memref<8x256xi32, #tpu.memory_space<vmem>>, vector<8x256xi32>,
    } else {
    }
    %c0 = arith.constant 0 : index
    %c0_1 = arith.constant 0 : index
    %3 = vector.load %arg4[%c0, %c0_1] : memref<256x128xbf16, #tpu.memory_space<vmem>>, vector<256x128xbf16>
    %c0_2 = arith.constant 0 : index
    %c0_3 = arith.constant 0 : index
    %4 = vector.load %arg6[%c0_2, %c0_3] : memref<128x128xbf16, #tpu.memory_space<vmem>>, vector<128x128xbf16>
    %cst = arith.constant dense<0.000000e+00> : vector<256x128xf32>
    %5 = tpu.matmul %3, %4, %cst {dimension_numbers = #tpu.dot_dimension_numbers<[1], [0], [0], [1], [0, 0, 1, 1], [], []>} : vector<256x128xbf16>, vector<128x128xbf16>, vector<256x128xf32> -> vector<256x128xf32>
    %c0_4 = arith.constant 0 : index
    %c0_5 = arith.constant 0 : index
    %6 = vector.load %arg7[%c0_4, %c0_5] : memref<1x128xf32, #tpu.memory_space<vmem>>, vector<1x128xf32>
    %7 = vector.broadcast %6 : vector<1x128xf32> to vector<256x128xf32>
    %8 = arith.addf %5, %7 : vector<256x128xf32>
    %cst_6 = arith.constant 0.000000e+00 : f32
    %9 = vector.broadcast %cst_6 : f32 to vector<256x128xf32>
    %10 = arith.maximumf %8, %9 : vector<256x128xf32>
    %11 = vector.broadcast %cst_6 : f32 to vector<256x128xf32>
    %12 = arith.subf %8, %11 : vector<256x128xf32>
    %13 = arith.cmpf one, %12, %12 : vector<256x128xf32>
    %14 = vector.broadcast %cst_6 : f32 to vector<256x128xf32>
    %15 = arith.addf %8, %14 : vector<256x128xf32>
    %16 = math.absf %12 : vector<256x128xf32>
    %cst_7 = arith.constant 0.000000e+00 : f32
    %17 = vector.broadcast %cst_7 : f32 to vector<256x128xf32>
    %18 = arith.subf %17, %16 : vector<256x128xf32>
    %19 = math.exp %18 : vector<256x128xf32>
    %20 = math.log1p %19 : vector<256x128xf32>
    %21 = arith.addf %10, %20 : vector<256x128xf32>
    %22 = arith.select %13, %15, %21 : vector<256x128xi1>, vector<256x128xf32>
    %cst_8 = arith.constant 2.000000e+00 : f32
    %23 = math.log %cst_8 : f32
    %24 = vector.broadcast %23 : f32 to vector<256x128xf32>
    %25 = arith.subf %22, %24 : vector<256x128xf32>
    %26 = arith.truncf %25 : vector<256x128xf32> to vector<256x128xbf16>
    %c0_9 = arith.constant 0 : index
    %c0_10 = arith.constant 0 : index
    %27 = vector.load %arg8[%c0_9, %c0_10] : memref<128x128xbf16, #tpu.memory_space<vmem>>, vector<128x128xbf16>
    %cst_11 = arith.constant dense<0.000000e+00> : vector<256x128xf32>
    %28 = tpu.matmul %26, %27, %cst_11 {dimension_numbers = #tpu.dot_dimension_numbers<[1], [0], [0], [1], [0, 0, 1, 1], [], []>} : vector<256x128xbf16>, vector<128x128xbf16>, vector<256x128xf32> -> vector<256x128xf32>
    %c0_12 = arith.constant 0 : index
    %c0_13 = arith.constant 0 : index
    %29 = vector.load %arg9[%c0_12, %c0_13] : memref<1x128xf32, #tpu.memory_space<vmem>>, vector<1x128xf32>
    %30 = vector.broadcast %29 : vector<1x128xf32> to vector<256x128xf32>
    %31 = arith.addf %28, %30 : vector<256x128xf32>
    %c0_14 = arith.constant 0 : index
    %c0_15 = arith.constant 0 : index
    %32 = vector.load %arg5[%c0_14, %c0_15] : memref<256x1xf32, #tpu.memory_space<vmem>>, vector<256x1xf32>
    %33 = vector.broadcast %32 : vector<256x1xf32> to vector<256x128xf32>
    %34 = arith.mulf %31, %33 : vector<256x128xf32>
    %c0_16 = arith.constant 0 : index
    %c0_17 = arith.constant 0 : index
    %35 = vector.load %arg3[%c0_16, %c0_17] : memref<256x1xi32, #tpu.memory_space<vmem>>, vector<256x1xi32>
    %c0_18 = arith.constant 0 : index
    %c0_19 = arith.constant 0 : index
    %36 = vector.load %arg16[%c0_18, %c0_19] : memref<256x8xi32, #tpu.memory_space<vmem>>, vector<256x8xi32>
    %37 = vector.broadcast %35 : vector<256x1xi32> to vector<256x8xi32>
    %38 = arith.cmpi eq, %37, %36 : vector<256x8xi32>
    %39 = arith.extui %38 : vector<256x8xi1> to vector<256x8xi32>
    %40 = arith.sitofp %39 : vector<256x8xi32> to vector<256x8xf32>
    %41 = arith.truncf %40 : vector<256x8xf32> to vector<256x8xbf16>
    %c0_20 = arith.constant 0 : index
    %c0_21 = arith.constant 0 : index
    %42 = vector.load %arg1[%c0_20, %c0_21] : memref<8x128xbf16, #tpu.memory_space<vmem>>, vector<8x128xbf16>
    %cst_22 = arith.constant dense<0.000000e+00> : vector<256x128xf32>
    %43 = tpu.matmul %41, %42, %cst_22 {dimension_numbers = #tpu.dot_dimension_numbers<[1], [0], [0], [1], [0, 0, 1, 1], [], []>} : vector<256x8xbf16>, vector<8x128xbf16>, vector<256x128xf32> -> vector<256x128xf32>
    %44 = arith.mulf %43, %34 : vector<256x128xf32>
    %c0_23 = arith.constant 0 : index
    %c0_24 = arith.constant 0 : index
    %45 = vector.load %arg2[%c0_23, %c0_24] : memref<1x256xi32, #tpu.memory_space<vmem>>, vector<1x256xi32>
    %c0_25 = arith.constant 0 : index
    %c0_26 = arith.constant 0 : index
    %46 = vector.load %arg17[%c0_25, %c0_26] : memref<8x256xi32, #tpu.memory_space<vmem>>, vector<8x256xi32>
    %47 = vector.broadcast %45 : vector<1x256xi32> to vector<8x256xi32>
    %48 = arith.cmpi eq, %47, %46 : vector<8x256xi32>
    %49 = arith.extui %48 : vector<8x256xi1> to vector<8x256xi32>
    %50 = arith.sitofp %49 : vector<8x256xi32> to vector<8x256xf32>
    %51 = arith.truncf %50 : vector<8x256xf32> to vector<8x256xbf16>
    %c0_27 = arith.constant 0 : index
    %c0_28 = arith.constant 0 : index
    %52 = vector.load %arg15[%c0_27, %c0_28] : memref<8x128xf32, #tpu.memory_space<vmem>>, vector<8x128xf32>
    %53 = arith.truncf %44 : vector<256x128xf32> to vector<256x128xbf16>
    %cst_29 = arith.constant dense<0.000000e+00> : vector<8x128xf32>
    %54 = tpu.matmul %51, %53, %cst_29 {dimension_numbers = #tpu.dot_dimension_numbers<[1], [0], [0], [1], [0, 0, 1, 1], [], []>} : vector<8x256xbf16>, vector<256x128xbf16>, vector<8x128xf32> -> vector<8x128xf32>
    %55 = arith.addf %52, %54 : vector<8x128xf32>
    %c0_30 = arith.constant 0 : index
    %c0_31 = arith.constant 0 : index
    %56 = vector.load %arg15[%c0_30, %c0_31] : memref<8x128xf32, #tpu.memory_space<vmem>>, vector<8x128xf32>
    tpu.vector_store %arg15[%c0_30, %c0_31], %55 {strides = array<i32>} : memref<8x128xf32, #tpu.memory_space<vmem>>, vector<8x128xf32>,
    %c1_i32 = arith.constant 1 : i32
    %57 = arith.cmpi eq, %arg0, %c1_i32 : i32
    %58 = arith.extui %57 : i1 to i32
    %c0_i32_32 = arith.constant 0 : i32
    %59 = arith.cmpi ne, %58, %c0_i32_32 : i32
    scf.if %59 {
      %c0_33 = arith.constant 0 : index
      %c0_34 = arith.constant 0 : index
      %60 = vector.load %arg15[%c0_33, %c0_34] : memref<8x128xf32, #tpu.memory_space<vmem>>, vector<8x128xf32>
      %61 = arith.truncf %60 : vector<8x128xf32> to vector<8x128xbf16>
      %c0_35 = arith.constant 0 : index
      %c0_36 = arith.constant 0 : index
      %62 = vector.load %arg10[%c0_35, %c0_36] : memref<128x128xbf16, #tpu.memory_space<vmem>>, vector<128x128xbf16>
      %cst_37 = arith.constant dense<0.000000e+00> : vector<8x128xf32>
      %63 = tpu.matmul %61, %62, %cst_37 {dimension_numbers = #tpu.dot_dimension_numbers<[1], [0], [0], [1], [0, 0, 1, 1], [], []>} : vector<8x128xbf16>, vector<128x128xbf16>, vector<8x128xf32> -> vector<8x128xf32>
      %c0_38 = arith.constant 0 : index
      %c0_39 = arith.constant 0 : index
      %64 = vector.load %arg11[%c0_38, %c0_39] : memref<1x128xf32, #tpu.memory_space<vmem>>, vector<1x128xf32>
      %65 = vector.broadcast %64 : vector<1x128xf32> to vector<8x128xf32>
      %66 = arith.addf %63, %65 : vector<8x128xf32>
      %cst_40 = arith.constant 0.000000e+00 : f32
      %67 = vector.broadcast %cst_40 : f32 to vector<8x128xf32>
      %68 = arith.maximumf %66, %67 : vector<8x128xf32>
      %69 = vector.broadcast %cst_40 : f32 to vector<8x128xf32>
      %70 = arith.subf %66, %69 : vector<8x128xf32>
      %71 = arith.cmpf one, %70, %70 : vector<8x128xf32>
      %72 = vector.broadcast %cst_40 : f32 to vector<8x128xf32>
      %73 = arith.addf %66, %72 : vector<8x128xf32>
      %74 = math.absf %70 : vector<8x128xf32>
      %cst_41 = arith.constant 0.000000e+00 : f32
      %75 = vector.broadcast %cst_41 : f32 to vector<8x128xf32>
      %76 = arith.subf %75, %74 : vector<8x128xf32>
      %77 = math.exp %76 : vector<8x128xf32>
      %78 = math.log1p %77 : vector<8x128xf32>
      %79 = arith.addf %68, %78 : vector<8x128xf32>
      %80 = arith.select %71, %73, %79 : vector<8x128xi1>, vector<8x128xf32>
      %cst_42 = arith.constant 2.000000e+00 : f32
      %81 = math.log %cst_42 : f32
      %82 = vector.broadcast %81 : f32 to vector<8x128xf32>
      %83 = arith.subf %80, %82 : vector<8x128xf32>
      %84 = arith.truncf %83 : vector<8x128xf32> to vector<8x128xbf16>
      %c0_43 = arith.constant 0 : index
      %c0_44 = arith.constant 0 : index
      %85 = vector.load %arg12[%c0_43, %c0_44] : memref<128x128xbf16, #tpu.memory_space<vmem>>, vector<128x128xbf16>
      %cst_45 = arith.constant dense<0.000000e+00> : vector<8x128xf32>
      %86 = tpu.matmul %84, %85, %cst_45 {dimension_numbers = #tpu.dot_dimension_numbers<[1], [0], [0], [1], [0, 0, 1, 1], [], []>} : vector<8x128xbf16>, vector<128x128xbf16>, vector<8x128xf32> -> vector<8x128xf32>
      %c0_46 = arith.constant 0 : index
      %c0_47 = arith.constant 0 : index
      %87 = vector.load %arg13[%c0_46, %c0_47] : memref<1x128xf32, #tpu.memory_space<vmem>>, vector<1x128xf32>
      %88 = vector.broadcast %87 : vector<1x128xf32> to vector<8x128xf32>
      %89 = arith.addf %86, %88 : vector<8x128xf32>
      %c0_48 = arith.constant 0 : index
      %c0_49 = arith.constant 0 : index
      %90 = vector.load %arg14[%c0_48, %c0_49] : memref<8x128xf32, #tpu.memory_space<vmem>>, vector<8x128xf32>
      tpu.vector_store %arg14[%c0_48, %c0_49], %89 {strides = array<i32>} : memref<8x128xf32, #tpu.memory_space<vmem>>, vector<8x128xf32>,
    } else {
    }
    return
  }
  func.func @transform_0(%arg0: i32) -> (i32, i32) {
    %c0_i32 = arith.constant 0 : i32
    %c0_i32_0 = arith.constant 0 : i32
    %c0_i32_1 = arith.constant 0 : i32
    return %c0_i32, %c0_i32_0 : i32, i32
  }
  func.func @transform_1(%arg0: i32) -> (i32, i32) {
    %c0_i32 = arith.constant 0 : i32
    %c0_i32_0 = arith.constant 0 : i32
    return %c0_i32, %arg0 : i32, i32
  }
  func.func @transform_2(%arg0: i32) -> (i32, i32) {
    %c0_i32 = arith.constant 0 : i32
    %c0_i32_0 = arith.constant 0 : i32
    return %arg0, %c0_i32 : i32, i32
  }
  func.func @transform_3(%arg0: i32) -> (i32, i32) {
    %c0_i32 = arith.constant 0 : i32
    %c0_i32_0 = arith.constant 0 : i32
    return %arg0, %c0_i32 : i32, i32
  }
  func.func @transform_4(%arg0: i32) -> (i32, i32) {
    %c0_i32 = arith.constant 0 : i32
    %c0_i32_0 = arith.constant 0 : i32
    return %arg0, %c0_i32 : i32, i32
  }
  func.func @transform_5(%arg0: i32) -> (i32, i32) {
    %c0_i32 = arith.constant 0 : i32
    %c0_i32_0 = arith.constant 0 : i32
    %c0_i32_1 = arith.constant 0 : i32
    return %c0_i32, %c0_i32_0 : i32, i32
  }
  func.func @transform_6(%arg0: i32) -> (i32, i32) {
    %c0_i32 = arith.constant 0 : i32
    %c0_i32_0 = arith.constant 0 : i32
    %c0_i32_1 = arith.constant 0 : i32
    return %c0_i32, %c0_i32_0 : i32, i32
  }
  func.func @transform_7(%arg0: i32) -> (i32, i32) {
    %c0_i32 = arith.constant 0 : i32
    %c0_i32_0 = arith.constant 0 : i32
    %c0_i32_1 = arith.constant 0 : i32
    return %c0_i32, %c0_i32_0 : i32, i32
  }
  func.func @transform_8(%arg0: i32) -> (i32, i32) {
    %c0_i32 = arith.constant 0 : i32
    %c0_i32_0 = arith.constant 0 : i32
    %c0_i32_1 = arith.constant 0 : i32
    return %c0_i32, %c0_i32_0 : i32, i32
  }
  func.func @transform_9(%arg0: i32) -> (i32, i32) {
    %c0_i32 = arith.constant 0 : i32
    %c0_i32_0 = arith.constant 0 : i32
    %c0_i32_1 = arith.constant 0 : i32
    return %c0_i32, %c0_i32_0 : i32, i32
  }
  func.func @transform_10(%arg0: i32) -> (i32, i32) {
    %c0_i32 = arith.constant 0 : i32
    %c0_i32_0 = arith.constant 0 : i32
    %c0_i32_1 = arith.constant 0 : i32
    return %c0_i32, %c0_i32_0 : i32, i32
  }
  func.func @transform_11(%arg0: i32) -> (i32, i32) {
    %c0_i32 = arith.constant 0 : i32
    %c0_i32_0 = arith.constant 0 : i32
    %c0_i32_1 = arith.constant 0 : i32
    return %c0_i32, %c0_i32_0 : i32, i32
  }
  func.func @transform_12(%arg0: i32) -> (i32, i32) {
    %c0_i32 = arith.constant 0 : i32
    %c0_i32_0 = arith.constant 0 : i32
    %c0_i32_1 = arith.constant 0 : i32
    return %c0_i32, %c0_i32_0 : i32, i32
  }
  func.func @transform_13(%arg0: i32) -> (i32, i32) {
    %c0_i32 = arith.constant 0 : i32
    %c0_i32_0 = arith.constant 0 : i32
    %c0_i32_1 = arith.constant 0 : i32
    return %c0_i32, %c0_i32_0 : i32, i32
  }
}

</mosaic_0001>

<bundles_post_ra>
// kernel: tpu_custom_call.1
= control target key start
LH: loop header
LB: loop body
LE: loop exit
PB: predicated region body
PF: predicated region fallthrough
CT: control target
= control target key end

     0   :  { %18 = vsyncpa [#allocation6], 0  ;;  %s3236_s25 = smov 0   ;;  %s4391_s0 = inlined_call_operand.vmem [shape: bf16[8,128], index: 0, kind: input, shape index: {}]   ;;  %s4392_s1 = inlined_call_operand.vmem [shape: s32[1,512], index: 1, kind: input, shape index: {}]   ;;  %s4393_s2 = inlined_call_operand.vmem [shape: s32[512,1], index: 2, kind: input, shape index: {}]   ;;  %s4394_s3 = inlined_call_operand.vmem [shape: bf16[512,128], index: 3, kind: input, shape index: {}]   ;;  %s4395_s4 = inlined_call_operand.vmem [shape: f32[512,1], index: 4, kind: input, shape index: {}]   ;;  %s4396_s5 = inlined_call_operand.vmem [shape: bf16[128,128], index: 5, kind: input, shape index: {}]   ;;  %s4397_s6 = inlined_call_operand.vmem [shape: f32[1,128], index: 6, kind: input, shape index: {}]   ;;  %s4398_s7 = inlined_call_operand.vmem [shape: bf16[128,128], index: 7, kind: input, shape index: {}]   ;;  %s4399_s8 = inlined_call_operand.vmem [shape: f32[1,128], index: 8, kind: input, shape index: {}]   ;;  %s4400_s9 = inlined_call_operand.vmem [shape: bf16[128,128], index: 9, kind: input, shape index: {}]   ;;  %s4401_s10 = inlined_call_operand.vmem [shape: f32[1,128], index: 10, kind: input, shape index: {}]   ;;  %s4402_s11 = inlined_call_operand.vmem [shape: bf16[128,128], index: 11, kind: input, shape index: {}]   ;;  %s4403_s12 = inlined_call_operand.vmem [shape: f32[1,128], index: 12, kind: input, shape index: {}]   ;;  %s4404_s13 = inlined_call_operand.hbm [shape: f32[8,128], index: 13, kind: output, shape index: {}]  }
   0x1 LB: > { %4406 = sst [smem:[#allocation8_spill]] %s3159_s25  ;;  %s3242_s26 = sadd.s32 4294967295, %s3159_s25   ;;  %s3159_s25 = sphi %s3236_s25, %s24_s25  }
   0x2   : > { %p2605_p0 = scmp.ge.s32.totalorder %s3159_s25, 1  ;;  %p416_p1 = scmp.lt.s32.totalorder %s3159_s25, 3 }
   0x4   : > { %p417_p2 = pnand %p2605_p0, %p416_p1 }
   0x5   : > { %s2606_s27 = sshll.u32 (!%p417_p2), %s3242_s26, 1  ;;  %s2607_s28 = sshll.u32 (!%p417_p2), %s3242_s26, 5 }
   0x6   : > { %420 = sbr.rel (%p417_p2) target bundleno = 1094 (0x446), region = 72  ;;  %p470_p3 = scmp.lt.s32.totalorder (!%p417_p2), %s2606_s27, 3 }
   0x7   : > { %p475_p4 = scmp.lt.s32.totalorder (!%p417_p2), %s2607_s28, 63  ;;  %p2613_p5 = scmp.ne.s32.totalorder (!%p417_p2), %s3242_s26, 0 }
   0xb   : > { %s4435_s27 = smov (!%p470_p3, %s2606_s27), 3  ;;  %s4437_s28 = smov (!%p475_p4, %s2607_s28), 63 }
   0xc   : > { %s472_s14 = scalar_lea.vmem %s4392_s1, %s4435_s27  ;;  %s2608_s15 = sshll.u32 %s4437_s28, 3 }
   0xd   : > { %s2610_s16 = sshll.u32 %s4437_s28, 2  ;;  %s3257_s19 = scalar_lea.vmem %s4393_s2, %s2608_s15 }
   0xe   : > { %s3262_s22 = scalar_lea.vmem %s4394_s3, %s2610_s16  ;;  %s3267_s25 = scalar_lea.vmem %s4395_s4, %s2608_s15 }
   0xf   : > { %496 = sbr.rel (%p2613_p5) target bundleno = 58 (0x3a), region = 76 }
  0x14   : > { %v498_v0 = vlaneseq  ;;  %v3161_v1 = vmov 0.0   ;;  %vm500_vm0 = vcmask 64512  }
  0x15   : > { %497 = vst [vmem:[#allocation2] sm:$0xff] %v3161_v1 }
  0x16   : > { %v499_v2 = vand.u32 127, %v498_v0  ;;  %v534_v3 = vshrl.u32 %v498_v0, 7 }
  0x18   : > { %501 = vst.msk [vmem:[#allocation3] sm:$0xff] %vm500_vm0, %v499_v2 }
  0x19   : > { %502 = vst.msk [vmem:[#allocation3 + $0x8] sm:$0xff] %vm500_vm0, %v499_v2 }
  0x1a   : > { %503 = vst.msk [vmem:[#allocation3 + $0x10] sm:$0xff] %vm500_vm0, %v499_v2 }
  0x1b   : > { %504 = vst.msk [vmem:[#allocation3 + $0x18] sm:$0xff] %vm500_vm0, %v499_v2 }
  0x1c   : > { %505 = vst.msk [vmem:[#allocation3 + $0x20] sm:$0xff] %vm500_vm0, %v499_v2 }
  0x1d   : > { %506 = vst.msk [vmem:[#allocation3 + $0x28] sm:$0xff] %vm500_vm0, %v499_v2 }
  0x1e   : > { %507 = vst.msk [vmem:[#allocation3 + $0x30] sm:$0xff] %vm500_vm0, %v499_v2 }
  0x1f   : > { %508 = vst.msk [vmem:[#allocation3 + $0x38] sm:$0xff] %vm500_vm0, %v499_v2 }
  0x20   : > { %509 = vst.msk [vmem:[#allocation3 + $0x40] sm:$0xff] %vm500_vm0, %v499_v2 }
  0x21   : > { %510 = vst.msk [vmem:[#allocation3 + $0x48] sm:$0xff] %vm500_vm0, %v499_v2 }
  0x22   : > { %511 = vst.msk [vmem:[#allocation3 + $0x50] sm:$0xff] %vm500_vm0, %v499_v2 }
  0x23   : > { %512 = vst.msk [vmem:[#allocation3 + $0x58] sm:$0xff] %vm500_vm0, %v499_v2 }
  0x24   : > { %513 = vst.msk [vmem:[#allocation3 + $0x60] sm:$0xff] %vm500_vm0, %v499_v2 }
  0x25   : > { %514 = vst.msk [vmem:[#allocation3 + $0x68] sm:$0xff] %vm500_vm0, %v499_v2 }
  0x26   : > { %515 = vst.msk [vmem:[#allocation3 + $0x70] sm:$0xff] %vm500_vm0, %v499_v2 }
  0x27   : > { %516 = vst.msk [vmem:[#allocation3 + $0x78] sm:$0xff] %vm500_vm0, %v499_v2 }
  0x28   : > { %517 = vst.msk [vmem:[#allocation3 + $0x80] sm:$0xff] %vm500_vm0, %v499_v2 }
  0x29   : > { %518 = vst.msk [vmem:[#allocation3 + $0x88] sm:$0xff] %vm500_vm0, %v499_v2 }
  0x2a   : > { %519 = vst.msk [vmem:[#allocation3 + $0x90] sm:$0xff] %vm500_vm0, %v499_v2 }
  0x2b   : > { %520 = vst.msk [vmem:[#allocation3 + $0x98] sm:$0xff] %vm500_vm0, %v499_v2 }
  0x2c   : > { %521 = vst.msk [vmem:[#allocation3 + $0xa0] sm:$0xff] %vm500_vm0, %v499_v2 }
  0x2d   : > { %522 = vst.msk [vmem:[#allocation3 + $0xa8] sm:$0xff] %vm500_vm0, %v499_v2 }
  0x2e   : > { %523 = vst.msk [vmem:[#allocation3 + $0xb0] sm:$0xff] %vm500_vm0, %v499_v2 }
  0x2f   : > { %524 = vst.msk [vmem:[#allocation3 + $0xb8] sm:$0xff] %vm500_vm0, %v499_v2 }
  0x30   : > { %525 = vst.msk [vmem:[#allocation3 + $0xc0] sm:$0xff] %vm500_vm0, %v499_v2 }
  0x31   : > { %526 = vst.msk [vmem:[#allocation3 + $0xc8] sm:$0xff] %vm500_vm0, %v499_v2 }
  0x32   : > { %527 = vst.msk [vmem:[#allocation3 + $0xd0] sm:$0xff] %vm500_vm0, %v499_v2 }
  0x33   : > { %528 = vst.msk [vmem:[#allocation3 + $0xd8] sm:$0xff] %vm500_vm0, %v499_v2 }
  0x34   : > { %529 = vst.msk [vmem:[#allocation3 + $0xe0] sm:$0xff] %vm500_vm0, %v499_v2 }
  0x35   : > { %530 = vst.msk [vmem:[#allocation3 + $0xe8] sm:$0xff] %vm500_vm0, %v499_v2 }
  0x36   : > { %531 = vst.msk [vmem:[#allocation3 + $0xf0] sm:$0xff] %vm500_vm0, %v499_v2 }
  0x37   : > { %532 = vst.msk [vmem:[#allocation3 + $0xf8] sm:$0xff] %vm500_vm0, %v499_v2 }
  0x38   : > { %535 = vst [vmem:[#allocation4] sm:$0xff] %v534_v3 }
  0x39   : > { %536 = vst [vmem:[#allocation4 + $0x8] sm:$0xff] %v534_v3 }
  0x3a PF: > { %v1831_v4 = vld [vmem:[%s3257_s19 + $0x20] sm:$0xff]  ;;  %v1829_v5 = vld [vmem:[%s3257_s19 + $0x10] sm:$0xff]  ;;  %v3162_v7 = vmov 0   ;;  %v2921_v8 = vld [vmem:[%s4396_s5 + $0x38] sm:$0xff]  ;;  %vm2149_vm1 = vcmask 1043456   ;;  %vm2100_vm4 = vcmask 64512  }
  0x3b   : > { %v1827_v6 = vld [vmem:[%s3257_s19] sm:$0xff]  ;;  %2983 = vset.pattern.permute.xlu2 %v3162_v7  ;;  %2982 = vset.pattern.permute.xlu1 %v3162_v7  ;;  %v2920_v9 = vld [vmem:[%s4396_s5 + $0x30] sm:$0xff]  ;;  %v1832_v10 = vld [vmem:[%s3257_s19 + $0x28] sm:$0xff]  ;;  %p2828_p6 = scmp.ne.s32.totalorder %s3242_s26, 1 }
  0x3c   : > { %2981 = vset.pattern.permute.xlu0 %v3162_v7  ;;  %1904 = vperm.xlu2 %2983, %v1831_v4   ;;  %v1830_v11 = vld [vmem:[%s3257_s19 + $0x18] sm:$0xff]  ;;  %v1828_v12 = vld [vmem:[%s3257_s19 + $0x8] sm:$0xff]  ;;  %v2918_v14 = vld [vmem:[%s4396_s5 + $0x20] sm:$0xff] }
  0x3d   : > { %1898 = vperm.xlu1 %2982, %v1829_v5   ;;  %1892 = vperm.xlu0 %2981, %v1827_v6   ;;  %v2919_v13 = vld [vmem:[%s4396_s5 + $0x28] sm:$0xff]  ;;  %v1835_v15 = vld [vmem:[%s3257_s19 + $0x40] sm:$0xff]  ;;  %v1834_v16 = vld [vmem:[%s3257_s19 + $0x38] sm:$0xff] }
  0x3e   : > { %733 = vmatpush.bf16.msra.mxu0 %v2921_v8  ;;  %2946 = vmatpush.bf16.msra.mxu3 %v2921_v8  ;;  %v1833_v17 = vld [vmem:[%s3257_s19 + $0x30] sm:$0xff]  ;;  %v2917_v18 = vld [vmem:[%s4396_s5 + $0x18] sm:$0xff]  ;;  %v1836_v22 = vld [vmem:[%s3257_s19 + $0x48] sm:$0xff] }
  0x3f   : > { %v2916_v19 = vld [vmem:[%s4396_s5 + $0x10] sm:$0xff]  ;;  %v1838_v20 = vld [vmem:[%s3257_s19 + $0x58] sm:$0xff]  ;;  %v2915_v23 = vld [vmem:[%s4396_s5 + $0x8] sm:$0xff] }
  0x40   : > { %v1837_v21 = vld [vmem:[%s3257_s19 + $0x50] sm:$0xff]  ;;  %v2914_v24 = vld [vmem:[%s4396_s5] sm:$0xff]  ;;  %v1840_v26 = vld [vmem:[%s3257_s19 + $0x68] sm:$0xff] }
  0x41   : > { %v1841_v25 = vld [vmem:[%s3257_s19 + $0x70] sm:$0xff]  ;;  %v1839_v27 = vld [vmem:[%s3257_s19 + $0x60] sm:$0xff]  ;;  %v2911_v29 = vld [vmem:[%s3262_s22 + $0x68] sm:$0xff] }
  0x42   : > { %734 = vmatpush.bf16.msra.mxu0 %v2920_v9  ;;  %2947 = vmatpush.bf16.msra.mxu3 %v2920_v9  ;;  %v2898_v28 = vld [vmem:[%s3262_s22] sm:$0xff]  ;;  %v1844_v30 = vld [vmem:[%s3257_s19 + $0x88] sm:$0xff]  ;;  %v1842_v32 = vld [vmem:[%s3257_s19 + $0x78] sm:$0xff] }
  0x43   : > { %v1843_v31 = vld [vmem:[%s3257_s19 + $0x80] sm:$0xff]  ;;  %v1846_v34 = vld [vmem:[%s3257_s19 + $0x98] sm:$0xff]  ;;  %v1845_v35 = vld [vmem:[%s3257_s19 + $0x90] sm:$0xff] }
  0x44   : > { %1907 = vperm.xlu2 %2983, %v1832_v10   ;;  %v1847_v33 = vld [vmem:[%s3257_s19 + $0xa0] sm:$0xff]  ;;  %v2899_v36 = vld [vmem:[%s3262_s22 + $0x8] sm:$0xff]  ;;  %v2912_v37 = vld [vmem:[%s3262_s22 + $0x70] sm:$0xff] }
  0x45   : > { %1901 = vperm.xlu1 %2982, %v1830_v11   ;;  %1895 = vperm.xlu0 %2981, %v1828_v12   ;;  %v1850_v38 = vld [vmem:[%s3257_s19 + $0xb8] sm:$0xff]  ;;  %v1849_v39 = vld [vmem:[%s3257_s19 + $0xb0] sm:$0xff]  ;;  %v1848_v40 = vld [vmem:[%s3257_s19 + $0xa8] sm:$0xff]  ;;  %v3163_v12 = vmov 0.0  }
  0x46   : > { %735 = vmatpush.bf16.msra.mxu0 %v2919_v13  ;;  %2948 = vmatpush.bf16.msra.mxu3 %v2919_v13  ;;  %v1853_v41 = vld [vmem:[%s3257_s19 + $0xd0] sm:$0xff]  ;;  %v1852_v42 = vld [vmem:[%s3257_s19 + $0xc8] sm:$0xff]  ;;  %v1851_v43 = vld [vmem:[%s3257_s19 + $0xc0] sm:$0xff] }
  0x47   : > { %v2900_v44 = vld [vmem:[%s3262_s22 + $0x10] sm:$0xff]  ;;  %v2913_v45 = vld [vmem:[%s3262_s22 + $0x78] sm:$0xff]  ;;  %v1856_v46 = vld [vmem:[%s3257_s19 + $0xe8] sm:$0xff] }
  0x48   : > { %v1855_v47 = vld [vmem:[%s3257_s19 + $0xe0] sm:$0xff]  ;;  %v1854_v48 = vld [vmem:[%s3257_s19 + $0xd8] sm:$0xff]  ;;  %v1617_v49 = vld [vmem:[%s3267_s25 + $0x70] sm:$0xff] }
  0x49   : > { %v1858_v50 = vld [vmem:[%s3257_s19 + $0xf8] sm:$0xff]  ;;  %v1857_v51 = vld [vmem:[%s3257_s19 + $0xf0] sm:$0xff]  ;;  %v1616_v53 = vld [vmem:[%s3267_s25 + $0x68] sm:$0xff] }
  0x4a   : > { %736 = vmatpush.bf16.msra.mxu0 %v2918_v14  ;;  %2949 = vmatpush.bf16.msra.mxu3 %v2918_v14  ;;  %v2901_v52 = vld [vmem:[%s3262_s22 + $0x18] sm:$0xff]  ;;  %v1615_v55 = vld [vmem:[%s3267_s25 + $0x60] sm:$0xff]  ;;  %v1613_v59 = vld [vmem:[%s3267_s25 + $0x50] sm:$0xff] }
  0x4b   : > { %v1618_v54 = vld [vmem:[%s3267_s25 + $0x78] sm:$0xff]  ;;  %v1611_v56 = vld [vmem:[%s3267_s25 + $0x40] sm:$0xff]  ;;  %v1612_v63 = vld [vmem:[%s3267_s25 + $0x48] sm:$0xff] }
  0x4c   : > { %1916 = vperm.xlu2 %2983, %v1835_v15   ;;  %v2099_v57 = vld [vmem:[%s4391_s0] sm:$0xf]  ;;  %v1614_v58 = vld [vmem:[%s3267_s25 + $0x58] sm:$0xff]  ;;  %v1609_v0 = vld [vmem:[%s3267_s25 + $0x30] sm:$0xff] }
  0x4d   : > { %1913 = vperm.xlu1 %2982, %v1834_v16   ;;  %1910 = vperm.xlu0 %2981, %v1833_v17   ;;  %v2902_v60 = vld [vmem:[%s3262_s22 + $0x20] sm:$0xff]  ;;  %v2151_v61 = vsel %vm2149_vm1, %v2099_v57, 0  ;;  %v1610_v62 = vld [vmem:[%s3267_s25 + $0x38] sm:$0xff]  ;;  %v1633_v2 = vld [vmem:[%s3267_s25 + $0xf0] sm:$0xff] }
  0x4e   : > { %737 = vmatpush.bf16.msra.mxu0 %v2917_v18  ;;  %2950 = vmatpush.bf16.msra.mxu3 %v2917_v18  ;;  %v1607_v1 = vld [vmem:[%s3267_s25 + $0x20] sm:$0xff]  ;;  %v1634_v3 = vld [vmem:[%s3267_s25 + $0xf8] sm:$0xff]  ;;  %v2903_v4 = vld [vmem:[%s3262_s22 + $0x28] sm:$0xff] }
  0x4f   : > { %2160 = vmatpush.bf16.msra.mxu2 %v2151_v61  ;;  %v1859_v6 = vld [vmem:[#allocation3] sm:$0xff]  ;;  %v1631_v8 = vld [vmem:[%s3267_s25 + $0xe0] sm:$0xff]  ;;  %v1860_v10 = vld [vmem:[#allocation3 + $0x8] sm:$0xff] }
  0x50   : > { %v1632_v7 = vld [vmem:[%s3267_s25 + $0xe8] sm:$0xff]  ;;  %v1629_v16 = vld [vmem:[%s3267_s25 + $0xd0] sm:$0xff]  ;;  %v1606_v18 = vld [vmem:[%s3267_s25 + $0x18] sm:$0xff] }
  0x51   : > { %v1608_v9 = vld [vmem:[%s3267_s25 + $0x28] sm:$0xff]  ;;  %v2906_v57 = vld [vmem:[%s3262_s22 + $0x40] sm:$0xff] }
  0x52   : > { %738 = vmatpush.bf16.msra.mxu0 %v2916_v19  ;;  %2951 = vmatpush.bf16.msra.mxu3 %v2916_v19  ;;  %v1605_v19 = vld [vmem:[%s3267_s25 + $0x10] sm:$0xff] }
  0x54   : > { %1925 = vperm.xlu2 %2983, %v1838_v20   ;;  %v2904_v20 = vld [vmem:[%s3262_s22 + $0x30] sm:$0xff] }
  0x55   : > { %1922 = vperm.xlu1 %2982, %v1837_v21   ;;  %1919 = vperm.xlu0 %2981, %v1836_v22   ;;  %v1861_v21 = vld [vmem:[#allocation3 + $0x10] sm:$0xff]  ;;  %v1862_v22 = vld [vmem:[#allocation3 + $0x18] sm:$0xff] }
  0x56   : > { %739 = vmatpush.bf16.msra.mxu0 %v2915_v23  ;;  %2952 = vmatpush.bf16.msra.mxu3 %v2915_v23 }
  0x5a   : > { %740 = vmatpush.bf16.msra.mxu0 %v2914_v24  ;;  %2953 = vmatpush.bf16.msra.mxu3 %v2914_v24  ;;  %v1604_v24 = vld [vmem:[%s3267_s25 + $0x8] sm:$0xff] }
  0x5c   : > { %1934 = vperm.xlu2 %2983, %v1841_v25   ;;  %v1630_v25 = vld [vmem:[%s3267_s25 + $0xd8] sm:$0xff] }
  0x5d   : > { %1931 = vperm.xlu1 %2982, %v1840_v26   ;;  %1928 = vperm.xlu0 %2981, %v1839_v27   ;;  %v1603_v26 = vld [vmem:[%s3267_s25] sm:$0xff] }
  0x5e   : > { %741 = vmatmul.bf16.vlgmr.msra.gmra.mxu0 %v2898_v28  ;;  %806 = vmatmul.bf16.vlgmr.msra.gmra.mxu3 %v2911_v29  ;;  %v2929_v29 = vld [vmem:[%s4398_s7 + $0x38] sm:$0xff] }
  0x5f   : > { %1514 = vmatpush.bf16.msra.mxu1 %v2929_v29  ;;  %2954 = vmatpush.bf16.msrb.mxu3 %v2929_v29 }
  0x64   : > { %1943 = vperm.xlu2 %2983, %v1844_v30  }
  0x65   : > { %1940 = vperm.xlu1 %2982, %v1843_v31   ;;  %1937 = vperm.xlu0 %2981, %v1842_v32   ;;  %v1625_v32 = vld [vmem:[%s3267_s25 + $0xb0] sm:$0xff] }
  0x6c   : > { %1952 = vperm.xlu2 %2983, %v1847_v33   ;;  %v1627_v33 = vld [vmem:[%s3267_s25 + $0xc0] sm:$0xff] }
  0x6d   : > { %1949 = vperm.xlu1 %2982, %v1846_v34   ;;  %1946 = vperm.xlu0 %2981, %v1845_v35   ;;  %v1628_v34 = vld [vmem:[%s3267_s25 + $0xc8] sm:$0xff]  ;;  %v2905_v35 = vld [vmem:[%s3262_s22 + $0x38] sm:$0xff] }
  0x6e   : > { %746 = vmatmul.bf16.gmra.mxu0 %v2899_v36  ;;  %811 = vmatmul.bf16.gmra.mxu3 %v2912_v37  ;;  %v2928_v36 = vld [vmem:[%s4398_s7 + $0x30] sm:$0xff]  ;;  %v1863_v37 = vld [vmem:[#allocation3 + $0x20] sm:$0xff] }
  0x6f   : > { %1515 = vmatpush.bf16.msra.mxu1 %v2928_v36  ;;  %2955 = vmatpush.bf16.msrb.mxu3 %v2928_v36  ;;  %v1871_v36 = vld [vmem:[#allocation3 + $0x60] sm:$0xff] }
  0x74   : > { %1961 = vperm.xlu2 %2983, %v1850_v38   ;;  %v1864_v38 = vld [vmem:[#allocation3 + $0x28] sm:$0xff] }
  0x75   : > { %1958 = vperm.xlu1 %2982, %v1849_v39   ;;  %1955 = vperm.xlu0 %2981, %v1848_v40   ;;  %v2927_v39 = vld [vmem:[%s4398_s7 + $0x28] sm:$0xff] }
  0x76   : > { %1516 = vmatpush.bf16.msra.mxu1 %v2927_v39  ;;  %2956 = vmatpush.bf16.msrb.mxu3 %v2927_v39 }
  0x7c   : > { %1970 = vperm.xlu2 %2983, %v1853_v41  }
  0x7d   : > { %1967 = vperm.xlu1 %2982, %v1852_v42   ;;  %1964 = vperm.xlu0 %2981, %v1851_v43   ;;  %v1624_v42 = vld [vmem:[%s3267_s25 + $0xa8] sm:$0xff]  ;;  %v1626_v43 = vld [vmem:[%s3267_s25 + $0xb8] sm:$0xff] }
  0x7e   : > { %751 = vmatmul.bf16.gmra.mxu0 %v2900_v44  ;;  %816 = vmatmul.bf16.gmra.mxu3 %v2913_v45  ;;  %v1623_v44 = vld [vmem:[%s3267_s25 + $0xa0] sm:$0xff] }
  0x7f   : > { %v2926_v45 = vld [vmem:[%s4398_s7 + $0x20] sm:$0xff] }
  0x80   : > { %1517 = vmatpush.bf16.msra.mxu1 %v2926_v45  ;;  %2957 = vmatpush.bf16.msrb.mxu3 %v2926_v45 }
  0x84   : > { %1979 = vperm.xlu2 %2983, %v1856_v46  }
  0x85   : > { %1976 = vperm.xlu1 %2982, %v1855_v47   ;;  %1973 = vperm.xlu0 %2981, %v1854_v48   ;;  %v2925_v48 = vld [vmem:[%s4398_s7 + $0x18] sm:$0xff] }
  0x86   : > { %1518 = vmatpush.bf16.msra.mxu1 %v2925_v48  ;;  %2958 = vmatpush.bf16.msrb.mxu3 %v2925_v48 }
  0x8c   : > { %1707 = vperm.xlu2 %2983, %v1617_v49  }
  0x8d   : > { %1985 = vperm.xlu1 %2982, %v1858_v50   ;;  %1982 = vperm.xlu0 %2981, %v1857_v51   ;;  %v3428_v50 = vld [vmem:[%s4397_s6] ss:$0 sm:$0xff] }
  0x8e   : > { %756 = vmatmul.bf16.gmra.mxu0 %v2901_v52  ;;  %v1619_v52 = vld [vmem:[%s3267_s25 + $0x80] sm:$0xff] }
  0x94   : > { %1702 = vperm.xlu2 %2983, %v1616_v53  }
  0x95   : > { %1712 = vperm.xlu0 %2981, %v1618_v54   ;;  %1697 = vperm.xlu1 %2982, %v1615_v55   ;;  %v1621_v55 = vld [vmem:[%s3267_s25 + $0x90] sm:$0xff] }
  0x96   : > { %v1905_v30 = vpop.permute.xlu2 %1904 }
  0x97   : > { %vm1991_vm7 = vcmp.eq.s32.totalorder %v1905_v30, %v1863_v37 }
  0x98   : > { %v2778_v46 = vsel %vm1991_vm7, 1.0, %v3163_v12 }
  0x9c   : > { %1677 = vperm.xlu2 %2983, %v1611_v56   ;;  %v1622_v56 = vld [vmem:[%s3267_s25 + $0x98] sm:$0xff] }
  0x9d   : > { %1692 = vperm.xlu1 %2982, %v1614_v58   ;;  %1687 = vperm.xlu0 %2981, %v1613_v59   ;;  %v2924_v59 = vld [vmem:[%s4398_s7 + $0x10] sm:$0xff] }
  0x9e   : > { %761 = vmatmul.bf16.gmra.mxu0 %v2902_v60  ;;  %v1908_v40 = vpop.permute.xlu2 %1907  ;;  %1519 = vmatpush.bf16.msra.mxu1 %v2924_v59 }
  0x9f   : > { %vm1992_vm8 = vcmp.eq.s32.totalorder %v1908_v40, %v1864_v38  ;;  %2959 = vmatpush.bf16.msrb.mxu3 %v2924_v59  ;;  %v1874_v40 = vld [vmem:[#allocation3 + $0x78] sm:$0xff] }
  0xa0   : > { %v2779_v47 = vsel %vm1992_vm8, 1.0, %v3163_v12 }
  0xa1   : > { %v2085_v49 = vpack.c.bf16 %v2779_v47, %v2778_v46 }
  0xa4   : > { %1672 = vperm.xlu2 %2983, %v1610_v62   ;;  %v2923_v62 = vld [vmem:[%s4398_s7 + $0x8] sm:$0xff] }
  0xa5   : > { %1682 = vperm.xlu0 %2981, %v1612_v63   ;;  %1667 = vperm.xlu1 %2982, %v1609_v0   ;;  %v1866_v63 = vld [vmem:[#allocation3 + $0x38] sm:$0xff] }
  0xa6   : > { %v3431_v53 = vpop.permute.xlu2 %1916  ;;  %1520 = vmatpush.bf16.msra.mxu1 %v2923_v62  ;;  %2960 = vmatpush.bf16.msrb.mxu3 %v2923_v62 }
  0xac   : > { %1657 = vperm.xlu2 %2983, %v1607_v1   ;;  %v1865_v1 = vld [vmem:[#allocation3 + $0x30] sm:$0xff] }
  0xad   : > { %1787 = vperm.xlu0 %2981, %v1633_v2   ;;  %1792 = vperm.xlu1 %2982, %v1634_v3  }
  0xae   : > { %766 = vmatmul.bf16.gmra.mxu0 %v2903_v4 }
  0xaf   : > { %v1893_v5 = vpop.permute.xlu0 %1892  ;;  %v1899_v11 = vpop.permute.xlu1 %1898 }
  0xb0   : > { %vm1987_vm2 = vcmp.eq.s32.totalorder %v1893_v5, %v1859_v6  ;;  %vm1989_vm5 = vcmp.eq.s32.totalorder %v1899_v11, %v1861_v21  ;;  %v1620_v5 = vld [vmem:[%s3267_s25 + $0x88] sm:$0xff] }
  0xb1   : > { %v2774_v13 = vsel %vm1987_vm2, 1.0, %v3163_v12  ;;  %v2776_v27 = vsel %vm1989_vm5, 1.0, %v3163_v12 }
  0xb4   : > { %1782 = vperm.xlu2 %2983, %v1632_v7  }
  0xb5   : > { %1777 = vperm.xlu1 %2982, %v1631_v8   ;;  %1662 = vperm.xlu0 %2981, %v1608_v9   ;;  %v2922_v8 = vld [vmem:[%s4398_s7] sm:$0xff]  ;;  %v1926_v9 = vpop.permute.xlu2 %1925 }
  0xb6   : > { %1521 = vmatpush.bf16.msra.mxu1 %v2922_v8  ;;  %2961 = vmatpush.bf16.msrb.mxu3 %v2922_v8 }
  0xb7   : > { %v1896_v14 = vpop.permute.xlu0 %1895  ;;  %v1902_v23 = vpop.permute.xlu1 %1901 }
  0xb8   : > { %vm1988_vm3 = vcmp.eq.s32.totalorder %v1896_v14, %v1860_v10  ;;  %vm1990_vm6 = vcmp.eq.s32.totalorder %v1902_v23, %v1862_v22  ;;  %v1870_v23 = vld [vmem:[#allocation3 + $0x58] sm:$0xff] }
  0xb9   : > { %v2775_v15 = vsel %vm1988_vm3, 1.0, %v3163_v12  ;;  %v2777_v28 = vsel %vm1990_vm6, 1.0, %v3163_v12  ;;  %vm1998_vm12 = vcmp.eq.s32.totalorder %v1926_v9, %v1870_v23 }
  0xba   : > { %v2083_v17 = vpack.c.bf16 %v2775_v15, %v2774_v13  ;;  %v2084_v31 = vpack.c.bf16 %v2777_v28, %v2776_v27  ;;  %v2907_v27 = vld [vmem:[%s3262_s22 + $0x48] sm:$0xff]  ;;  %v3486_v45 = vsel %vm1998_vm12, 1.0, %v3163_v12 }
  0xbc   : > { %2806 = vmatmul.msk.bf16.vlgmr.msra.gmra.mxu2 %vm2100_vm4, %v2083_v17  ;;  %1767 = vperm.xlu2 %2983, %v1629_v16  }
  0xbd   : > { %1652 = vperm.xlu1 %2982, %v1606_v18   ;;  %1647 = vperm.xlu0 %2981, %v1605_v19   ;;  %v1867_v18 = vld [vmem:[#allocation3 + $0x40] sm:$0xff]  ;;  %v1935_v39 = vpop.permute.xlu2 %1934 }
  0xbe   : > { %771 = vmatmul.bf16.gmra.mxu0 %v2904_v20  ;;  %vm1995_vm11 = vcmp.eq.s32.totalorder %v3431_v53, %v1867_v18 }
  0xbf   : > { %v3412_v41 = vpop.permute.xlu0 %1910  ;;  %v1914_v51 = vpop.permute.xlu1 %1913  ;;  %v3480_v38 = vsel %vm1995_vm11, 1.0, %v3163_v12 }
  0xc0   : > { %vm1994_vm9 = vcmp.eq.s32.totalorder %v1914_v51, %v1866_v63  ;;  %vm1993_vm10 = vcmp.eq.s32.totalorder %v3412_v41, %v1865_v1 }
  0xc1   : > { %v2781_v16 = vsel %vm1994_vm9, 1.0, %v3163_v12  ;;  %v2780_v17 = vsel %vm1993_vm10, 1.0, %v3163_v12 }
  0xc4   : > { %1642 = vperm.xlu2 %2983, %v1604_v24   ;;  %v2086_v24 = vpack.c.bf16 %v2781_v16, %v2780_v17 }
  0xc5   : > { %1772 = vperm.xlu0 %2981, %v1630_v25   ;;  %1637 = vperm.xlu1 %2982, %v1603_v26   ;;  %v1869_v25 = vld [vmem:[#allocation3 + $0x50] sm:$0xff] }
  0xc7   : > { %v3433_v54 = vpop.permute.xlu0 %1919  ;;  %v1923_v6 = vpop.permute.xlu1 %1922 }
  0xc8   : > { %vm1997_vm13 = vcmp.eq.s32.totalorder %v1923_v6, %v1869_v25 }
  0xc9   : > { %v3490_v46 = vsel %vm1997_vm13, 1.0, %v3163_v12 }
  0xcc   : > { %2807 = vmatmul.msk.bf16.gmra.mxu2 %vm2100_vm4, %v2084_v31  ;;  %1747 = vperm.xlu2 %2983, %v1625_v32   ;;  %v1873_v31 = vld [vmem:[#allocation3 + $0x70] sm:$0xff]  ;;  %v1868_v32 = vld [vmem:[#allocation3 + $0x48] sm:$0xff] }
  0xcd   : > { %1757 = vperm.xlu0 %2981, %v1627_v33   ;;  %1762 = vperm.xlu1 %2982, %v1628_v34   ;;  %v1872_v34 = vld [vmem:[#allocation3 + $0x68] sm:$0xff]  ;;  %vm2001_vm14 = vcmp.eq.s32.totalorder %v1935_v39, %v1873_v31  ;;  %vm1996_vm15 = vcmp.eq.s32.totalorder %v3433_v54, %v1868_v32 }
  0xce   : > { %776 = vmatmul.bf16.gmra.mxu0 %v2905_v35  ;;  %v3497_v53 = vsel %vm2001_vm14, 1.0, %v3163_v12  ;;  %v2783_v54 = vsel %vm1996_vm15, 1.0, %v3163_v12  ;;  %v2908_v32 = vld [vmem:[%s3262_s22 + $0x50] sm:$0xff] }
  0xcf   : > { %v3457_v10 = vpop.permute.xlu0 %1928  ;;  %v1932_v35 = vpop.permute.xlu1 %1931 }
  0xd0   : > { %vm2000_vm0 = vcmp.eq.s32.totalorder %v1932_v35, %v1872_v34  ;;  %vm1999_vm1 = vcmp.eq.s32.totalorder %v3457_v10, %v1871_v36 }
  0xd1   : > { %v3511_v62 = vsel %vm1999_vm1, 1.0, %v3163_v12 }
  0xd4   : > { %1742 = vperm.xlu2 %2983, %v1624_v42  }
  0xd5   : > { %1752 = vperm.xlu0 %2981, %v1626_v43   ;;  %1737 = vperm.xlu1 %2982, %v1623_v44  }
  0xd7   : > { %v1938_v41 = vpop.permute.xlu0 %1937 }
  0xd8   : > { %vm2002_vm2 = vcmp.eq.s32.totalorder %v1938_v41, %v1874_v40 }
  0xd9   : > { %v3515_v63 = vsel %vm2002_vm2, 1.0, %v3163_v12 }
  0xda   : > { %v2090_v16 = vpack.c.bf16 %v3515_v63, %v3497_v53 }
  0xdb   : > { %v742_v58 = vpop.f32.mrf.mxu0 }
  0xdc   : > { %v3442_v60 = vadd.f32 %v3428_v50, %v742_v58  ;;  %2808 = vmatmul.msk.bf16.gmra.mxu2 %vm2100_vm4, %v2085_v49  ;;  %1717 = vperm.xlu2 %2983, %v1619_v52   ;;  %v3503_v58 = vsel %vm2000_vm0, 1.0, %v3163_v12 }
  0xdd   : > { %1727 = vperm.xlu0 %2981, %v1621_v55   ;;  %1732 = vperm.xlu1 %2982, %v1622_v56  }
  0xde   : > { %v918_v61 = vand.u32 2147483647, %v3442_v60  ;;  %781 = vmatmul.bf16.gmra.mxu0 %v2906_v57  ;;  %v2088_v57 = vpack.c.bf16 %v3486_v45, %v3490_v46  ;;  %v822_v17 = vmax.f32 %v3442_v60, 0.0  ;;  %vm854_vm6 = vcmp.ne.f32.partialorder %v3442_v60, %v3442_v60 }
  0xe0   : > { %v950_v0 = vsub.f32 0.0, %v918_v61 }
  0xe1   : > { %v807_v2 = vpop.f32.mrf.mxu3 }
  0xe2   : > { %v982_v3 = vmul.f32 1.442695, %v950_v0  ;;  %v3450_v4 = vadd.f32 %v3428_v50, %v807_v2 }
  0xe3   : > { %v744_v7 = vpop.f32.mrf.mxu0 }
  0xe4   : > { %2986 = vpow2.f32 %v982_v3  ;;  %v944_v11 = vand.u32 2147483647, %v3450_v4  ;;  %v3461_v13 = vadd.f32 %v3428_v50, %v744_v7  ;;  %v2087_v7 = vpack.c.bf16 %v2783_v54, %v3480_v38 }
  0xe5   : > { %1722 = vperm.xlu0 %2981, %v1620_v5   ;;  %vm880_vm9 = vcmp.ne.f32.partialorder %v3450_v4, %v3450_v4 }
  0xe6   : > { %v976_v14 = vsub.f32 0.0, %v944_v11  ;;  %v919_v15 = vand.u32 2147483647, %v3461_v13  ;;  %v2089_v11 = vpack.c.bf16 %v3503_v58, %v3511_v62  ;;  %vm855_vm7 = vcmp.ne.f32.partialorder %v3461_v13, %v3461_v13 }
  0xe8   : > { %v1034_v19 = vmul.f32 1.442695, %v976_v14  ;;  %v951_v20 = vsub.f32 0.0, %v919_v15 }
  0xe9   : > { %v809_v21 = vpop.f32.mrf.mxu3 }
  0xea   : > { %v3466_v22 = vpop.eup %2986  ;;  %2988 = vpow2.f32 %v1034_v19  ;;  %v984_v26 = vmul.f32 1.442695, %v951_v20  ;;  %v3471_v28 = vadd.f32 %v3428_v50, %v809_v21  ;;  %v848_v21 = vmax.f32 %v3450_v4, 0.0 }
  0xeb   : > { %v747_v29 = vpop.f32.mrf.mxu0  ;;  %v1046_v30 = vadd.f32 1.0, %v3466_v22  ;;  %v1049_v51 = vmul.f32 -0.5, %v3466_v22  ;;  %v1052_v5 = vand.u32 2147483647, %v3466_v22 }
  0xec   : > { %2990 = vpow2.f32 %v984_v26  ;;  %v3475_v33 = vadd.f32 %v3428_v50, %v747_v29  ;;  %2809 = vmatmul.msk.bf16.gmra.mxu2 %vm2100_vm4, %v2086_v24  ;;  %v945_v37 = vand.u32 2147483647, %v3471_v28  ;;  %vm881_vm11 = vcmp.ne.f32.partialorder %v3471_v28, %v3471_v28 }
  0xed   : > { %2992 = vlog2.f32 %v1046_v30  ;;  %v1050_v3 = vadd.f32 1.0, %v1049_v51  ;;  %vm3537_vm5 = vcmp.lt.f32.partialorder %v1052_v5, 0.0004427343 }
  0xee   : > { %v920_v42 = vand.u32 2147483647, %v3475_v33  ;;  %786 = vmatmul.bf16.gmra.mxu0 %v2907_v27  ;;  %v977_v43 = vsub.f32 0.0, %v945_v37  ;;  %vm856_vm12 = vcmp.ne.f32.partialorder %v3475_v33, %v3475_v33 }
  0xef   : > { %v1051_v25 = vmul.f32 %v3466_v22, %v1050_v3 }
  0xf0   : > { %v2989_v44 = vpop.eup %2988  ;;  %v1036_v48 = vmul.f32 1.442695, %v977_v43  ;;  %v952_v56 = vsub.f32 0.0, %v920_v42  ;;  %v823_v43 = vmax.f32 %v3461_v13, 0.0 }
  0xf1   : > { %v1280_v47 = vadd.f32 1.0, %v2989_v44  ;;  %v812_v49 = vpop.f32.mrf.mxu3  ;;  %v1283_v55 = vmul.f32 -0.5, %v2989_v44  ;;  %v1286_v2 = vand.u32 2147483647, %v2989_v44 }
  0xf2   : > { %v3494_v52 = vpop.eup %2990  ;;  %v3506_v59 = vadd.f32 %v3428_v50, %v812_v49  ;;  %v986_v9 = vmul.f32 1.442695, %v952_v56 }
  0xf3   : > { %2994 = vlog2.f32 %v1280_v47  ;;  %v749_v61 = vpop.f32.mrf.mxu0  ;;  %v2993_v1 = vpop.eup %2992  ;;  %v1055_v6 = vadd.f32 1.0, %v3494_v52  ;;  %v1284_v8 = vadd.f32 1.0, %v1283_v55  ;;  %v1058_v15 = vmul.f32 -0.5, %v3494_v52 }
  0xf4   : > { %2996 = vpow2.f32 %v1036_v48  ;;  %v3518_v0 = vadd.f32 %v3428_v50, %v749_v61  ;;  %v946_v14 = vand.u32 2147483647, %v3506_v59  ;;  %v1048_v19 = vmul.f32 0.6931472, %v2993_v1 }
  0xf5   : > { %2998 = vlog2.f32 %v1055_v6  ;;  %vm3532_vm3 = vcmp.lt.f32.partialorder %v1286_v2, 0.0004427343  ;;  %v1285_v30 = vmul.f32 %v2989_v44, %v1284_v8  ;;  %v1059_v38 = vadd.f32 1.0, %v1058_v15 }
  0xf6   : > { %v921_v10 = vand.u32 2147483647, %v3518_v0  ;;  %3000 = vpow2.f32 %v986_v9  ;;  %v978_v36 = vsub.f32 0.0, %v946_v14  ;;  %v1054_v40 = vsel %vm3537_vm5, %v1051_v25, %v1048_v19 }
  0xf7   : > { %v1061_v41 = vand.u32 2147483647, %v3494_v52  ;;  %v1060_v55 = vmul.f32 %v3494_v52, %v1059_v38  ;;  %v1334_v56 = vadd.f32 %v1054_v40, %v822_v17  ;;  %v849_v1 = vmax.f32 %v3471_v28, 0.0 }
  0xf8   : > { %v953_v18 = vsub.f32 0.0, %v921_v10  ;;  %v1038_v2 = vmul.f32 1.442695, %v978_v36  ;;  %v824_v6 = vmax.f32 %v3475_v33, 0.0  ;;  %vm857_vm13 = vcmp.ne.f32.partialorder %v3518_v0, %v3518_v0 }
  0xf9   : > { %v2995_v20 = vpop.eup %2994  ;;  %v814_v24 = vpop.f32.mrf.mxu3  ;;  %vm1062_vm8 = vcmp.lt.f32.partialorder %v1061_v41, 0.0004427343  ;;  %v1366_v19 = vsel %vm854_vm6, %v3442_v60, %v1334_v56  ;;  %v825_v56 = vmax.f32 %v3518_v0, 0.0  ;;  %vm882_vm0 = vcmp.ne.f32.partialorder %v3506_v59, %v3506_v59 }
  0xfa   : > { %v2997_v27 = vpop.eup %2996  ;;  %v1282_v29 = vmul.f32 0.6931472, %v2995_v20  ;;  %v988_v31 = vmul.f32 1.442695, %v953_v18  ;;  %v3545_v22 = vadd.f32 %v3428_v50, %v814_v24  ;;  %v850_v24 = vmax.f32 %v3506_v59, 0.0 }
  0xfb   : > { %v1289_v34 = vadd.f32 1.0, %v2997_v27  ;;  %v1292_v35 = vmul.f32 -0.5, %v2997_v27  ;;  %v752_v37 = vpop.f32.mrf.mxu0  ;;  %v2999_v42 = vpop.eup %2998  ;;  %v1295_v44 = vand.u32 2147483647, %v2997_v27 }
  0xfc   : > { %v3548_v39 = vadd.f32 %v3428_v50, %v752_v37  ;;  %2810 = vmatmul.msk.bf16.gmra.mxu2 %vm2100_vm4, %v2087_v7  ;;  %v1288_v47 = vsel %vm3532_vm3, %v1285_v30, %v1282_v29  ;;  %v947_v49 = vand.u32 2147483647, %v3545_v22  ;;  %v1057_v54 = vmul.f32 0.6931472, %v2999_v42  ;;  %v3562_v61 = vpop.eup %3000 }
  0xfd   : > { %3002 = vlog2.f32 %v1289_v34  ;;  %v1293_v48 = vadd.f32 1.0, %v1292_v35  ;;  %v1360_v5 = vadd.f32 %v1288_v47, %v848_v21  ;;  %vm3568_vm10 = vcmp.lt.f32.partialorder %v1295_v44, 0.0004427343 }
  0xfe   : > { %3004 = vpow2.f32 %v988_v31  ;;  %791 = vmatmul.bf16.gmra.mxu0 %v2908_v32  ;;  %v922_v51 = vand.u32 2147483647, %v3548_v39  ;;  %v979_v3 = vsub.f32 0.0, %v947_v49  ;;  %v1063_v8 = vsel %vm1062_vm8, %v1060_v55, %v1057_v54 }
  0xff   : > { %v1294_v9 = vmul.f32 %v2997_v27, %v1293_v48  ;;  %v1335_v18 = vadd.f32 %v1063_v8, %v823_v43  ;;  %v1064_v20 = vadd.f32 1.0, %v3562_v61  ;;  %3006 = vpow2.f32 %v1038_v2 }
 0x100   : > { %v954_v15 = vsub.f32 0.0, %v922_v51  ;;  %v1040_v25 = vmul.f32 1.442695, %v979_v3  ;;  %v1392_v60 = vsel %vm880_vm9, %v3450_v4, %v1360_v5  ;;  %v2710_v31 = vadd.f32 -0.6931472, %v1366_v19  ;;  %v2909_v51 = vld [vmem:[%s3262_s22 + $0x58] sm:$0xff] }
 0x101   : > { %v817_v7 = vpop.f32.mrf.mxu3  ;;  %v1367_v29 = vsel %vm855_vm7, %v3461_v13, %v1335_v18  ;;  %3008 = vlog2.f32 %v1064_v20  ;;  %v1067_v37 = vmul.f32 -0.5, %v3562_v61  ;;  %v2736_v38 = vadd.f32 -0.6931472, %v1392_v60 }
 0x102   : > { %v3573_v52 = vadd.f32 %v3428_v50, %v817_v7  ;;  %v2711_v32 = vadd.f32 -0.6931472, %v1367_v29  ;;  %v990_v35 = vmul.f32 1.442695, %v954_v15  ;;  %3010 = vpow2.f32 %v1040_v25 }
 0x103   : > { %v3003_v14 = vpop.eup %3002  ;;  %v754_v17 = vpop.f32.mrf.mxu0  ;;  %v1068_v44 = vadd.f32 1.0, %v1067_v37  ;;  %v1070_v54 = vand.u32 2147483647, %v3562_v61  ;;  %v826_v5 = vmax.f32 %v3548_v39, 0.0  ;;  %vm883_vm3 = vcmp.ne.f32.partialorder %v3545_v22, %v3545_v22 }
 0x104   : > { %v3582_v21 = vpop.eup %3004  ;;  %v1291_v23 = vmul.f32 0.6931472, %v3003_v14  ;;  %v948_v26 = vand.u32 2147483647, %v3573_v52  ;;  %v3587_v27 = vadd.f32 %v3428_v50, %v754_v17  ;;  %v1430_v13 = vpack.c.bf16 %v2711_v32, %v2710_v31 }
 0x105   : > { %v1073_v40 = vadd.f32 1.0, %v3582_v21  ;;  %v3606_v47 = vpop.eup %3006  ;;  %v1076_v55 = vmul.f32 -0.5, %v3582_v21  ;;  %v1069_v15 = vmul.f32 %v3562_v61, %v1068_v44  ;;  %vm1071_vm14 = vcmp.lt.f32.partialorder %v1070_v54, 0.0004427343 }
 0x106   : > { %v1297_v30 = vsel %vm3568_vm10, %v1294_v9, %v1291_v23  ;;  %v923_v36 = vand.u32 2147483647, %v3587_v27  ;;  %v980_v41 = vsub.f32 0.0, %v948_v26  ;;  %1522 = vmatmul.bf16.vlgmr.msra.gmra.mxu1 %v1430_v13  ;;  %v1079_v46 = vand.u32 2147483647, %v3582_v21 }
 0x107   : > { %v1361_v34 = vadd.f32 %v1297_v30, %v849_v1  ;;  %3012 = vlog2.f32 %v1073_v40  ;;  %v3009_v3 = vpop.eup %3008  ;;  %v1077_v20 = vadd.f32 1.0, %v1076_v55  ;;  %v852_v23 = vmax.f32 %v3573_v52, 0.0 }
 0x108   : > { %v955_v4 = vsub.f32 0.0, %v923_v36  ;;  %3014 = vpow2.f32 %v990_v35  ;;  %v1042_v10 = vmul.f32 1.442695, %v980_v41  ;;  %v1066_v14 = vmul.f32 0.6931472, %v3009_v3  ;;  %v3011_v17 = vpop.eup %3010 }
 0x109   : > { %v819_v42 = vpop.f32.mrf.mxu3  ;;  %v1393_v43 = vsel %vm881_vm11, %v3471_v28, %v1361_v34  ;;  %v851_v28 = vmax.f32 %v3545_v22, 0.0  ;;  %v1301_v26 = vmul.f32 -0.5, %v3606_v47  ;;  %v1307_v30 = vadd.f32 1.0, %v3011_v17 }
 0x10a   : > { %v3609_v48 = vadd.f32 %v3428_v50, %v819_v42  ;;  %v2737_v49 = vadd.f32 -0.6931472, %v1393_v43  ;;  %v992_v1 = vmul.f32 1.442695, %v955_v4  ;;  %v1072_v45 = vsel %vm1071_vm14, %v1069_v15, %v1066_v14 }
 0x10b   : > { %v757_v2 = vpop.f32.mrf.mxu0  ;;  %v1336_v25 = vadd.f32 %v1072_v45, %v824_v6  ;;  %v1310_v31 = vmul.f32 -0.5, %v3011_v17  ;;  %v1078_v34 = vmul.f32 %v3582_v21, %v1077_v20  ;;  %v1304_v35 = vand.u32 2147483647, %v3606_v47 }
 0x10c   : > { %v949_v7 = vand.u32 2147483647, %v3609_v48  ;;  %v3621_v8 = vadd.f32 %v3428_v50, %v757_v2  ;;  %v1443_v9 = vpack.c.bf16 %v2737_v49, %v2736_v38  ;;  %2811 = vmatmul.msk.bf16.gmra.mxu2 %vm2100_vm4, %v2088_v57  ;;  %3016 = vpow2.f32 %v992_v1 }
 0x10d   : > { %v1298_v57 = vadd.f32 1.0, %v3606_v47  ;;  %v3013_v29 = vpop.eup %3012  ;;  %vm1080_vm15 = vcmp.lt.f32.partialorder %v1079_v46, 0.0004427343  ;;  %v1368_v6 = vsel %vm856_vm12, %v3475_v33, %v1336_v25  ;;  %v1302_v13 = vadd.f32 1.0, %v1301_v26 }
 0x10e   : > { %v981_v18 = vsub.f32 0.0, %v949_v7  ;;  %v924_v19 = vand.u32 2147483647, %v3621_v8  ;;  %1587 = vmatmul.bf16.vlgmr.msrb.gmra.mxu3 %v1443_v9  ;;  %796 = vmatmul.bf16.gmra.mxu0 %v2909_v51  ;;  %v1075_v32 = vmul.f32 0.6931472, %v3013_v29  ;;  %v3015_v36 = vpop.eup %3014  ;;  %v1311_v21 = vadd.f32 1.0, %v1310_v31  ;;  %v3662_v7 = vpop.permute.xlu2 %1943 }
 0x10f   : > { %3018 = vlog2.f32 %v1298_v57  ;;  %v1313_v43 = vand.u32 2147483647, %v3011_v17  ;;  %v2712_v49 = vadd.f32 -0.6931472, %v1368_v6  ;;  %v1303_v33 = vmul.f32 %v3606_v47, %v1302_v13  ;;  %v3664_v9 = vpop.permute.xlu1 %1940  ;;  %v2910_v57 = vld [vmem:[%s3262_s22 + $0x60] sm:$0xff] }
 0x110   : > { %v1044_v61 = vmul.f32 1.442695, %v981_v18  ;;  %v956_v60 = vsub.f32 0.0, %v924_v19  ;;  %3020 = vpow2.f32 %v1042_v10  ;;  %v1081_v40 = vsel %vm1080_vm15, %v1078_v34, %v1075_v32 }
 0x111   : > { %3022 = vlog2.f32 %v1307_v30  ;;  %v1337_v42 = vadd.f32 %v1081_v40, %v825_v56  ;;  %vm3652_vm1 = vcmp.lt.f32.partialorder %v1304_v35, 0.0004427343  ;;  %v1312_v1 = vmul.f32 %v3011_v17, %v1311_v21 }
 0x112   : > { %v3648_v41 = vpop.eup %3016  ;;  %3024 = vpow2.f32 %v1044_v61  ;;  %v994_v4 = vmul.f32 1.442695, %v956_v60  ;;  %v1082_v2 = vadd.f32 1.0, %v3015_v36  ;;  %v1085_v3 = vmul.f32 -0.5, %v3015_v36 }
 0x113   : > { %v759_v37 = vpop.f32.mrf.mxu0  ;;  %v1369_v55 = vsel %vm857_vm13, %v3518_v0, %v1337_v42  ;;  %v1091_v15 = vadd.f32 1.0, %v3648_v41  ;;  %vm3667_vm2 = vcmp.lt.f32.partialorder %v1313_v43, 0.0004427343  ;;  %v1094_v17 = vmul.f32 -0.5, %v3648_v41 }
 0x114   : > { %v3644_v38 = vadd.f32 %v3428_v50, %v759_v37  ;;  %v2713_v10 = vadd.f32 -0.6931472, %v1369_v55  ;;  %3026 = vlog2.f32 %v1082_v2  ;;  %v1086_v0 = vadd.f32 1.0, %v1085_v3 }
 0x115   : > { %v3019_v54 = vpop.eup %3018  ;;  %v1088_v61 = vand.u32 2147483647, %v3015_v36  ;;  %v827_v26 = vmax.f32 %v3587_v27, 0.0  ;;  %3028 = vlog2.f32 %v1091_v15  ;;  %v1095_v34 = vadd.f32 1.0, %v1094_v17 }
 0x116   : > { %v925_v44 = vand.u32 2147483647, %v3644_v38  ;;  %v3660_v56 = vpop.eup %3020  ;;  %v1300_v14 = vmul.f32 0.6931472, %v3019_v54  ;;  %v1431_v20 = vpack.c.bf16 %v2713_v10, %v2712_v49  ;;  %3030 = vpow2.f32 %v994_v4  ;;  %v3707_v49 = vld [vmem:[#allocation3 + $0x88] sm:$0xff] }
 0x117   : > { %v3023_v18 = vpop.eup %3022  ;;  %v1097_v37 = vand.u32 2147483647, %v3648_v41  ;;  %v1087_v40 = vmul.f32 %v3015_v36, %v1086_v0  ;;  %vm3699_vm5 = vcmp.lt.f32.partialorder %v1088_v61, 0.0004427343  ;;  %v1316_v21 = vadd.f32 1.0, %v3660_v56  ;;  %v3717_v51 = vpop.permute.xlu1 %1949 }
 0x118   : > { %v957_v47 = vsub.f32 0.0, %v925_v44  ;;  %v1306_v45 = vsel %vm3652_vm1, %v1303_v33, %v1300_v14  ;;  %v1309_v46 = vmul.f32 0.6931472, %v3023_v18  ;;  %v3675_v25 = vpop.eup %3024  ;;  %1527 = vmatmul.bf16.gmra.mxu1 %v1431_v20  ;;  %v1319_v43 = vmul.f32 -0.5, %v3660_v56 }
 0x119   : > { %v1362_v30 = vadd.f32 %v1306_v45, %v850_v24  ;;  %vm3709_vm6 = vcmp.lt.f32.partialorder %v1097_v37, 0.0004427343  ;;  %v1325_v33 = vadd.f32 1.0, %v3675_v25  ;;  %v1322_v2 = vand.u32 2147483647, %v3660_v56 }
 0x11a   : > { %v996_v29 = vmul.f32 1.442695, %v957_v47  ;;  %v1315_v32 = vsel %vm3667_vm2, %v1312_v1, %v1309_v46  ;;  %v3027_v62 = vpop.eup %3026  ;;  %v1320_v15 = vadd.f32 1.0, %v1319_v43  ;;  %vm2004_vm7 = vcmp.eq.s32.totalorder %v3662_v7, %v3707_v49  ;;  %v1877_v7 = vld [vmem:[#allocation3 + $0x90] sm:$0xff] }
 0x11b   : > { %v762_v60 = vpop.f32.mrf.mxu0  ;;  %v1363_v24 = vadd.f32 %v1315_v32, %v851_v28  ;;  %v1394_v35 = vsel %vm882_vm0, %v3506_v59, %v1362_v30  ;;  %v1096_v28 = vmul.f32 %v3648_v41, %v1095_v34  ;;  %v1084_v42 = vmul.f32 0.6931472, %v3027_v62  ;;  %v3029_v44 = vpop.eup %3028 }
 0x11c   : > { %v3681_v31 = vadd.f32 %v3428_v50, %v762_v60  ;;  %2812 = vmatmul.msk.bf16.gmra.mxu2 %vm2100_vm4, %v2089_v11  ;;  %v2738_v13 = vadd.f32 -0.6931472, %v1394_v35  ;;  %3032 = vpow2.f32 %v996_v29  ;;  %v3715_v41 = vpop.permute.xlu2 %1952  ;;  %v1093_v1 = vmul.f32 0.6931472, %v3029_v44  ;;  %v3722_v3 = vpop.eup %3030  ;;  %v1875_v44 = vld [vmem:[#allocation3 + $0x80] sm:$0xff] }
 0x11d   : > { %v1395_v11 = vsel %vm883_vm3, %v3545_v22, %v1363_v24  ;;  %3034 = vlog2.f32 %v1316_v21  ;;  %v1328_v22 = vmul.f32 -0.5, %v3675_v25  ;;  %v1090_v55 = vsel %vm3699_vm5, %v1087_v40, %v1084_v42 }
 0x11e   : > { %v926_v6 = vand.u32 2147483647, %v3681_v31  ;;  %801 = vmatmul.bf16.gmra.mxu0 %v2910_v57  ;;  %v2739_v4 = vadd.f32 -0.6931472, %v1395_v11  ;;  %v1338_v14 = vadd.f32 %v1090_v55, %v826_v5  ;;  %3036 = vlog2.f32 %v1325_v33 }
 0x11f   : > { %vm858_vm8 = vcmp.ne.f32.partialorder %v3548_v39, %v3548_v39  ;;  %v1099_v19 = vsel %vm3709_vm6, %v1096_v28, %v1093_v1  ;;  %v1329_v0 = vadd.f32 1.0, %v1328_v22  ;;  %v853_v5 = vmax.f32 %v3609_v48, 0.0 }
 0x120   : > { %v958_v59 = vsub.f32 0.0, %v926_v6  ;;  %v1444_v54 = vpack.c.bf16 %v2739_v4, %v2738_v13  ;;  %v1339_v20 = vadd.f32 %v1099_v19, %v827_v26  ;;  %v1370_v45 = vsel %vm858_vm8, %v3548_v39, %v1338_v14 }
 0x121   : > { %v1331_v46 = vand.u32 2147483647, %v3675_v25  ;;  %vm859_vm9 = vcmp.ne.f32.partialorder %v3587_v27, %v3587_v27  ;;  %v1321_v61 = vmul.f32 %v3660_v56, %v1320_v15  ;;  %vm3744_vm10 = vcmp.lt.f32.partialorder %v1322_v2, 0.0004427343 }
 0x122   : > { %v998_v47 = vmul.f32 1.442695, %v958_v59  ;;  %1592 = vmatmul.bf16.gmra.mxu3 %v1444_v54  ;;  %v3735_v17 = vpop.eup %3032  ;;  %v1371_v30 = vsel %vm859_vm9, %v3587_v27, %v1339_v20  ;;  %v2714_v26 = vadd.f32 -0.6931472, %v1370_v45  ;;  %v1330_v39 = vmul.f32 %v3675_v25, %v1329_v0  ;;  %v3768_v59 = vpop.permute.xlu1 %1958 }
 0x123   : > { %v764_v10 = vpop.f32.mrf.mxu0  ;;  %v3035_v60 = vpop.eup %3034  ;;  %v2715_v34 = vadd.f32 -0.6931472, %v1371_v30  ;;  %v1100_v35 = vadd.f32 1.0, %v3722_v3  ;;  %vm884_vm11 = vcmp.ne.f32.partialorder %v3573_v52, %v3573_v52  ;;  %vm3753_vm12 = vcmp.lt.f32.partialorder %v1331_v46, 0.0004427343 }
 0x124   : > { %v3729_v18 = vadd.f32 %v3428_v50, %v764_v10  ;;  %3038 = vpow2.f32 %v998_v47  ;;  %v1318_v24 = vmul.f32 0.6931472, %v3035_v60  ;;  %v3037_v37 = vpop.eup %3036  ;;  %v1103_v6 = vmul.f32 -0.5, %v3722_v3  ;;  %v3766_v21 = vpop.permute.xlu2 %1961 }
 0x125   : > { %v1109_v27 = vadd.f32 1.0, %v3735_v17  ;;  %v1432_v40 = vpack.c.bf16 %v2715_v34, %v2714_v26  ;;  %v1327_v58 = vmul.f32 0.6931472, %v3037_v37  ;;  %vm885_vm13 = vcmp.ne.f32.partialorder %v3609_v48, %v3609_v48 }
 0x126   : > { %v927_v57 = vand.u32 2147483647, %v3729_v18  ;;  %v1324_v25 = vsel %vm3744_vm10, %v1321_v61, %v1318_v24  ;;  %3040 = vlog2.f32 %v1100_v35  ;;  %v1112_v28 = vmul.f32 -0.5, %v3735_v17 }
 0x127   : > { %v1364_v11 = vadd.f32 %v1324_v25, %v852_v23  ;;  %v1333_v42 = vsel %vm3753_vm12, %v1330_v39, %v1327_v58  ;;  %v1106_v23 = vand.u32 2147483647, %v3722_v3  ;;  %v1104_v22 = vadd.f32 1.0, %v1103_v6 }
 0x128   : > { %v959_v32 = vsub.f32 0.0, %v927_v57  ;;  %1532 = vmatmul.bf16.gmra.mxu1 %v1432_v40  ;;  %v1365_v36 = vadd.f32 %v1333_v42, %v853_v5  ;;  %v2791_v53 = vsel %vm2004_vm7, 1.0, %v3163_v12  ;;  %vm2003_vm14 = vcmp.eq.s32.totalorder %v3664_v9, %v1875_v44 }
 0x129   : > { %v1396_v33 = vsel %vm884_vm11, %v3573_v52, %v1364_v11  ;;  %v828_v10 = vmax.f32 %v3621_v8, 0.0  ;;  %v1105_v14 = vmul.f32 %v3722_v3, %v1104_v22  ;;  %vm3799_vm15 = vcmp.lt.f32.partialorder %v1106_v23, 0.0004427343 }
 0x12a   : > { %v1000_v13 = vmul.f32 1.442695, %v959_v32  ;;  %v3780_v43 = vpop.eup %3038  ;;  %v2740_v55 = vadd.f32 -0.6931472, %v1396_v33  ;;  %v1397_v63 = vsel %vm885_vm13, %v3609_v48, %v1365_v36  ;;  %v1115_v49 = vand.u32 2147483647, %v3735_v17  ;;  %v3817_v32 = vpop.permute.xlu1 %1967 }
 0x12b   : > { %v767_v62 = vpop.f32.mrf.mxu0  ;;  %v2741_v52 = vadd.f32 -0.6931472, %v1397_v63  ;;  %v1118_v2 = vadd.f32 1.0, %v3780_v43  ;;  %v1121_v46 = vmul.f32 -0.5, %v3780_v43  ;;  %v829_v30 = vmax.f32 %v3644_v38, 0.0 }
 0x12c   : > { %3042 = vpow2.f32 %v1000_v13  ;;  %v3771_v4 = vadd.f32 %v3428_v50, %v767_v62  ;;  %2813 = vmatmul.msk.bf16.gmra.mxu2 %vm2100_vm4, %v2090_v16  ;;  %v1113_v16 = vadd.f32 1.0, %v1112_v28  ;;  %v3041_v47 = vpop.eup %3040  ;;  %vm1116_vm0 = vcmp.lt.f32.partialorder %v1115_v49, 0.0004427343  ;;  %v3812_v39 = vpop.permute.xlu2 %1970 }
 0x12d   : > { %3044 = vlog2.f32 %v1109_v27  ;;  %v1445_v19 = vpack.c.bf16 %v2741_v52, %v2740_v55  ;;  %v1102_v0 = vmul.f32 0.6931472, %v3041_v47  ;;  %vm860_vm1 = vcmp.ne.f32.partialorder %v3621_v8, %v3621_v8  ;;  %v1947_v55 = vpop.permute.xlu0 %1946  ;;  %v1878_v52 = vld [vmem:[#allocation3 + $0x98] sm:$0xff] }
 0x12e   : > { %v928_v54 = vand.u32 2147483647, %v3771_v4  ;;  %3046 = vlog2.f32 %v1118_v2  ;;  %v1114_v45 = vmul.f32 %v3735_v17, %v1113_v16  ;;  %v2790_v17 = vsel %vm2003_vm14, 1.0, %v3163_v12 }
 0x12f   : > { %v1108_v29 = vsel %vm3799_vm15, %v1105_v14, %v1102_v0  ;;  %v1122_v56 = vadd.f32 1.0, %v1121_v46  ;;  %vm861_vm2 = vcmp.ne.f32.partialorder %v3644_v38, %v3644_v38  ;;  %v1124_v25 = vand.u32 2147483647, %v3780_v43 }
 0x130   : > { %v960_v1 = vsub.f32 0.0, %v928_v54  ;;  %v1340_v26 = vadd.f32 %v1108_v29, %v828_v10  ;;  %v2091_v11 = vpack.c.bf16 %v2791_v53, %v2790_v17  ;;  %v831_v63 = vmax.f32 %v3729_v18, 0.0 }
 0x131   : > { %v1123_v36 = vmul.f32 %v3780_v43, %v1122_v56  ;;  %vm1125_vm3 = vcmp.lt.f32.partialorder %v1124_v25, 0.0004427343  ;;  %v830_v2 = vmax.f32 %v3681_v31, 0.0  ;;  %vm2006_vm6 = vcmp.eq.s32.totalorder %v3717_v51, %v1878_v52 }
 0x132   : > { %v3043_v15 = vpop.eup %3042  ;;  %v1002_v48 = vmul.f32 1.442695, %v960_v1  ;;  %1597 = vmatmul.bf16.gmra.mxu3 %v1445_v19  ;;  %v1372_v37 = vsel %vm860_vm1, %v3621_v8, %v1340_v26  ;;  %v3842_v49 = vpop.permute.xlu1 %1976  ;;  %vm863_vm7 = vcmp.ne.f32.partialorder %v3729_v18, %v3729_v18  ;;  %vm2005_vm8 = vcmp.eq.s32.totalorder %v1947_v55, %v1877_v7 }
 0x133   : > { %v3045_v5 = vpop.eup %3044  ;;  %v769_v20 = vpop.f32.mrf.mxu0  ;;  %v1127_v57 = vadd.f32 1.0, %v3043_v15  ;;  %v1130_v61 = vmul.f32 -0.5, %v3043_v15  ;;  %v2716_v40 = vadd.f32 -0.6931472, %v1372_v37  ;;  %v1133_v58 = vand.u32 2147483647, %v3043_v15 }
 0x134   : > { %3048 = vpow2.f32 %v1002_v48  ;;  %v3807_v3 = vadd.f32 %v3428_v50, %v769_v20  ;;  %v1111_v60 = vmul.f32 0.6931472, %v3045_v5  ;;  %v3047_v27 = vpop.eup %3046  ;;  %v3840_v14 = vpop.permute.xlu2 %1979  ;;  %vm862_vm9 = vcmp.ne.f32.partialorder %v3681_v31, %v3681_v31 }
 0x135   : > { %3050 = vlog2.f32 %v1127_v57  ;;  %v1131_v6 = vadd.f32 1.0, %v1130_v61  ;;  %v1120_v23 = vmul.f32 0.6931472, %v3047_v27  ;;  %vm1134_vm5 = vcmp.lt.f32.partialorder %v1133_v58, 0.0004427343 }
 0x136   : > { %v929_v34 = vand.u32 2147483647, %v3807_v3  ;;  %v1117_v24 = vsel %vm1116_vm0, %v1114_v45, %v1111_v60  ;;  %v2792_v17 = vsel %vm2005_vm8, 1.0, %v3163_v12  ;;  %vm865_vm12 = vcmp.ne.f32.partialorder %v3807_v3, %v3807_v3 }
 0x137   : > { %v1341_v35 = vadd.f32 %v1117_v24, %v829_v30  ;;  %v1132_v33 = vmul.f32 %v3043_v15, %v1131_v6  ;;  %v1126_v43 = vsel %vm1125_vm3, %v1123_v36, %v1120_v23  ;;  %v3873_v23 = vld [vmem:[%s4397_s6] ss:$0 sm:$0xff]  ;;  %vm864_vm14 = vcmp.ne.f32.partialorder %v3771_v4, %v3771_v4 }
 0x138   : > { %v961_v13 = vsub.f32 0.0, %v929_v34  ;;  %v1342_v48 = vadd.f32 %v1126_v43, %v830_v2  ;;  %v1956_v34 = vpop.permute.xlu0 %1955  ;;  %v1880_v43 = vld [vmem:[#allocation3 + $0xa8] sm:$0xff] }
 0x139   : > { %v1373_v9 = vsel %vm861_vm2, %v3644_v38, %v1341_v35  ;;  %vm2008_vm13 = vcmp.eq.s32.totalorder %v1956_v34, %v1880_v43 }
 0x13a   : > { %v3827_v62 = vpop.eup %3048  ;;  %v1004_v28 = vmul.f32 1.442695, %v961_v13  ;;  %v2717_v42 = vadd.f32 -0.6931472, %v1373_v9  ;;  %v1374_v29 = vsel %vm862_vm9, %v3681_v31, %v1342_v48 }
 0x13b   : > { %v3051_v8 = vpop.eup %3050  ;;  %v772_v44 = vpop.f32.mrf.mxu0  ;;  %v1136_v53 = vadd.f32 1.0, %v3827_v62  ;;  %v1139_v45 = vmul.f32 -0.5, %v3827_v62  ;;  %v2718_v37 = vadd.f32 -0.6931472, %v1374_v29  ;;  %v1142_v31 = vand.u32 2147483647, %v3827_v62 }
 0x13c   : > { %3052 = vpow2.f32 %v1004_v28  ;;  %v1433_v22 = vpack.c.bf16 %v2717_v42, %v2716_v40  ;;  %v3831_v54 = vadd.f32 %v3428_v50, %v772_v44  ;;  %2814 = vmatmul.msk.bf16.gmra.mxu2 %vm2100_vm4, %v2091_v11  ;;  %v1129_v38 = vmul.f32 0.6931472, %v3051_v8  ;;  %v3865_v9 = vpop.permute.xlu2 %1707  ;;  %v3867_v40 = vpop.permute.xlu1 %1985 }
 0x13d   : > { %3054 = vlog2.f32 %v1136_v53  ;;  %v1140_v24 = vadd.f32 1.0, %v1139_v45  ;;  %vm1143_vm10 = vcmp.lt.f32.partialorder %v1142_v31, 0.0004427343 }
 0x13e   : > { %1537 = vmatmul.bf16.gmra.mxu1 %v1433_v22  ;;  %v930_v16 = vand.u32 2147483647, %v3831_v54  ;;  %v1135_v1 = vsel %vm1134_vm5, %v1132_v33, %v1129_v38  ;;  %v833_v33 = vmax.f32 %v3807_v3, 0.0  ;;  %vm866_vm5 = vcmp.ne.f32.partialorder %v3831_v54, %v3831_v54 }
 0x13f   : > { %v3838_v47 = vpop.f32.mrf.mxu2  ;;  %v1343_v10 = vadd.f32 %v1135_v1, %v831_v63  ;;  %v1141_v42 = vmul.f32 %v3827_v62, %v1140_v24  ;;  %v832_v63 = vmax.f32 %v3771_v4, 0.0 }
 0x140   : > { %v962_v15 = vsub.f32 0.0, %v930_v16  ;;  %v3885_v52 = vpop.permute.xlu0 %1964 }
 0x141   : > { %v1375_v20 = vsel %vm863_vm7, %v3729_v18, %v1343_v10  ;;  %v2793_v18 = vsel %vm2006_vm6, 1.0, %v3163_v12 }
 0x142   : > { %v3053_v19 = vpop.eup %3052  ;;  %v1006_v0 = vmul.f32 1.442695, %v962_v15  ;;  %v2719_v30 = vadd.f32 -0.6931472, %v1375_v20  ;;  %v2092_v13 = vpack.c.bf16 %v2793_v18, %v2792_v17  ;;  %v1879_v15 = vld [vmem:[#allocation3 + $0xa0] sm:$0xff] }
 0x143   : > { %v774_v5 = vpop.f32.mrf.mxu0  ;;  %v1145_v46 = vadd.f32 1.0, %v3053_v19  ;;  %v1148_v61 = vmul.f32 -0.5, %v3053_v19  ;;  %v3055_v26 = vpop.eup %3054  ;;  %v1151_v6 = vand.u32 2147483647, %v3053_v19  ;;  %vm2007_vm15 = vcmp.eq.s32.totalorder %v3715_v41, %v1879_v15 }
 0x144   : > { %3056 = vpow2.f32 %v1006_v0  ;;  %v3850_v57 = vadd.f32 %v3428_v50, %v774_v5  ;;  %v1434_v25 = vpack.c.bf16 %v2719_v30, %v2718_v37  ;;  %v1138_v58 = vmul.f32 0.6931472, %v3055_v26  ;;  %v3891_v20 = vpop.permute.xlu2 %1702  ;;  %v3893_v45 = vpop.permute.xlu1 %1697 }
 0x145   : > { %3058 = vlog2.f32 %v1145_v46  ;;  %v1149_v56 = vadd.f32 1.0, %v1148_v61  ;;  %vm1152_vm11 = vcmp.lt.f32.partialorder %v1151_v6, 0.0004427343  ;;  %v2795_v26 = vsel %vm2008_vm13, 1.0, %v3163_v12 }
 0x146   : > { %v931_v60 = vand.u32 2147483647, %v3850_v57  ;;  %v1144_v38 = vsel %vm1143_vm10, %v1141_v42, %v1138_v58  ;;  %vm867_vm2 = vcmp.ne.f32.partialorder %v3850_v57, %v3850_v57 }
 0x147   : > { %v3860_v50 = vpop.f32.mrf.mxu2  ;;  %v1150_v36 = vmul.f32 %v3053_v19, %v1149_v56  ;;  %v1344_v2 = vadd.f32 %v1144_v38, %v832_v63  ;;  %v2794_v56 = vsel %vm2007_vm15, 1.0, %v3163_v12 }
 0x148   : > { %v963_v35 = vsub.f32 0.0, %v931_v60  ;;  %v2093_v41 = vpack.c.bf16 %v2795_v26, %v2794_v56  ;;  %v3911_v34 = vpop.permute.xlu0 %1973 }
 0x149   : > { %v1376_v29 = vsel %vm864_vm14, %v3771_v4, %v1344_v2  ;;  %v1881_v2 = vld [vmem:[#allocation3 + $0xb0] sm:$0xff] }
 0x14a   : > { %v3863_v27 = vpop.eup %3056  ;;  %v1008_v51 = vmul.f32 1.442695, %v963_v35  ;;  %v2720_v35 = vadd.f32 -0.6931472, %v1376_v29  ;;  %vm2009_vm3 = vcmp.eq.s32.totalorder %v3768_v59, %v1881_v2 }
 0x14b   : > { %v3059_v11 = vpop.eup %3058  ;;  %v777_v28 = vpop.f32.mrf.mxu0  ;;  %v1154_v22 = vadd.f32 1.0, %v3863_v27  ;;  %v1157_v0 = vmul.f32 -0.5, %v3863_v27  ;;  %v1160_v4 = vand.u32 2147483647, %v3863_v27 }
 0x14c   : > { %3060 = vpow2.f32 %v1008_v51  ;;  %v3876_v8 = vadd.f32 %v3873_v23, %v777_v28  ;;  %2815 = vmatmul.msk.bf16.gmra.mxu2 %vm2100_vm4, %v2092_v13  ;;  %v1147_v44 = vmul.f32 0.6931472, %v3059_v11  ;;  %v3922_v38 = vpop.permute.xlu1 %1692 }
 0x14d   : > { %3062 = vlog2.f32 %v1154_v22  ;;  %v1158_v17 = vadd.f32 1.0, %v1157_v0  ;;  %vm1161_vm0 = vcmp.lt.f32.partialorder %v1160_v4, 0.0004427343 }
 0x14e   : > { %1542 = vmatmul.bf16.gmra.mxu1 %v1434_v25  ;;  %v932_v62 = vand.u32 2147483647, %v3876_v8  ;;  %v1153_v55 = vsel %vm1152_vm11, %v1150_v36, %v1147_v44 }
 0x14f   : > { %v3883_v53 = vpop.f32.mrf.mxu2  ;;  %v1345_v16 = vadd.f32 %v1153_v55, %v833_v33  ;;  %v1159_v28 = vmul.f32 %v3863_v27, %v1158_v17  ;;  %v835_v33 = vmax.f32 %v3850_v57, 0.0 }
 0x150   : > { %v964_v1 = vsub.f32 0.0, %v932_v62  ;;  %v3920_v62 = vpop.permute.xlu2 %1677 }
 0x151   : > { %v1377_v19 = vsel %vm865_vm12, %v3807_v3, %v1345_v16  ;;  %v834_v16 = vmax.f32 %v3831_v54, 0.0  ;;  %vm868_vm12 = vcmp.ne.f32.partialorder %v3876_v8, %v3876_v8 }
 0x152   : > { %v3061_v10 = vpop.eup %3060  ;;  %v1010_v7 = vmul.f32 1.442695, %v964_v1  ;;  %v2721_v60 = vadd.f32 -0.6931472, %v1377_v19  ;;  %v1882_v19 = vld [vmem:[#allocation3 + $0xb8] sm:$0xff] }
 0x153   : > { %v779_v48 = vpop.f32.mrf.mxu0  ;;  %v1163_v5 = vadd.f32 1.0, %v3061_v10  ;;  %v1166_v61 = vmul.f32 -0.5, %v3061_v10  ;;  %v3063_v30 = vpop.eup %3062  ;;  %v1169_v31 = vand.u32 2147483647, %v3061_v10  ;;  %vm2010_vm6 = vcmp.eq.s32.totalorder %v3766_v21, %v1882_v19 }
 0x154   : > { %3064 = vpow2.f32 %v1010_v7  ;;  %v3896_v46 = vadd.f32 %v3873_v23, %v779_v48  ;;  %v1435_v51 = vpack.c.bf16 %v2721_v60, %v2720_v35  ;;  %v1156_v25 = vmul.f32 0.6931472, %v3063_v30  ;;  %v3938_v30 = vpop.permute.xlu0 %1982 }
 0x155   : > { %3066 = vlog2.f32 %v1163_v5  ;;  %v1167_v37 = vadd.f32 1.0, %v1166_v61  ;;  %vm1170_vm1 = vcmp.lt.f32.partialorder %v1169_v31, 0.0004427343  ;;  %v2796_v35 = vsel %vm2009_vm3, 1.0, %v3163_v12  ;;  %v3950_v31 = vpop.permute.xlu1 %1667 }
 0x156   : > { %v933_v3 = vand.u32 2147483647, %v3896_v46  ;;  %v1162_v55 = vsel %vm1161_vm0, %v1159_v28, %v1156_v25  ;;  %v2797_v21 = vsel %vm2010_vm6, 1.0, %v3163_v12  ;;  %v836_v19 = vmax.f32 %v3876_v8, 0.0 }
 0x157   : > { %v3905_v18 = vpop.f32.mrf.mxu2  ;;  %v1168_v36 = vmul.f32 %v3061_v10, %v1167_v37  ;;  %v1346_v7 = vadd.f32 %v1162_v55, %v834_v16  ;;  %v837_v16 = vmax.f32 %v3896_v46, 0.0  ;;  %vm869_vm10 = vcmp.ne.f32.partialorder %v3896_v46, %v3896_v46 }
 0x158   : > { %v965_v24 = vsub.f32 0.0, %v933_v3  ;;  %v3948_v4 = vpop.permute.xlu2 %1672 }
 0x159   : > { %v1378_v26 = vsel %vm866_vm5, %v3831_v54, %v1346_v7 }
 0x15a   : > { %v3909_v6 = vpop.eup %3064  ;;  %v1012_v13 = vmul.f32 1.442695, %v965_v24  ;;  %v2722_v54 = vadd.f32 -0.6931472, %v1378_v26 }
 0x15b   : > { %v3067_v58 = vpop.eup %3066  ;;  %v782_v11 = vpop.f32.mrf.mxu0  ;;  %v1172_v22 = vadd.f32 1.0, %v3909_v6  ;;  %v1175_v61 = vmul.f32 -0.5, %v3909_v6 }
 0x15c   : > { %3068 = vpow2.f32 %v1012_v13  ;;  %v3915_v42 = vadd.f32 %v3873_v23, %v782_v11  ;;  %2816 = vmatmul.msk.bf16.gmra.mxu2 %vm2100_vm4, %v2093_v41  ;;  %v1165_v44 = vmul.f32 0.6931472, %v3067_v58  ;;  %v2094_v11 = vpack.c.bf16 %v2797_v21, %v2796_v35 }
 0x15d   : > { %3070 = vlog2.f32 %v1172_v22  ;;  %v1176_v56 = vadd.f32 1.0, %v1175_v61 }
 0x15e   : > { %1547 = vmatmul.bf16.gmra.mxu1 %v1435_v51  ;;  %v934_v27 = vand.u32 2147483647, %v3915_v42  ;;  %v1171_v63 = vsel %vm1170_vm1, %v1168_v36, %v1165_v44  ;;  %v1178_v51 = vand.u32 2147483647, %v3909_v6  ;;  %vm870_vm1 = vcmp.ne.f32.partialorder %v3915_v42, %v3915_v42 }
 0x15f   : > { %v3926_v43 = vpop.f32.mrf.mxu2  ;;  %v1347_v1 = vadd.f32 %v1171_v63, %v835_v33  ;;  %v1177_v22 = vmul.f32 %v3909_v6, %v1176_v56  ;;  %v1884_v6 = vld [vmem:[#allocation3 + $0xc8] sm:$0xff] }
 0x160   : > { %v966_v10 = vsub.f32 0.0, %v934_v27  ;;  %vm1179_vm7 = vcmp.lt.f32.partialorder %v1178_v51, 0.0004427343  ;;  %vm2012_vm9 = vcmp.eq.s32.totalorder %v3817_v32, %v1884_v6  ;;  %v3970_v26 = vpop.permute.xlu2 %1657 }
 0x161   : > { %v1379_v5 = vsel %vm867_vm2, %v3850_v57, %v1347_v1 }
 0x162   : > { %v3069_v15 = vpop.eup %3068  ;;  %v1014_v48 = vmul.f32 1.442695, %v966_v10  ;;  %v2723_v17 = vadd.f32 -0.6931472, %v1379_v5 }
 0x163   : > { %v784_v0 = vpop.f32.mrf.mxu0  ;;  %v1181_v29 = vadd.f32 1.0, %v3069_v15  ;;  %v1184_v60 = vmul.f32 -0.5, %v3069_v15  ;;  %v3071_v24 = vpop.eup %3070  ;;  %v1187_v25 = vand.u32 2147483647, %v3069_v15 }
 0x164   : > { %3072 = vpow2.f32 %v1014_v48  ;;  %v3934_v3 = vadd.f32 %v3873_v23, %v784_v0  ;;  %v1436_v28 = vpack.c.bf16 %v2723_v17, %v2722_v54  ;;  %v1174_v44 = vmul.f32 0.6931472, %v3071_v24  ;;  %v3964_v48 = vpop.permute.xlu0 %1712 }
 0x165   : > { %3074 = vlog2.f32 %v1181_v29  ;;  %v1185_v13 = vadd.f32 1.0, %v1184_v60  ;;  %vm1188_vm8 = vcmp.lt.f32.partialorder %v1187_v25, 0.0004427343 }
 0x166   : > { %v935_v57 = vand.u32 2147483647, %v3934_v3  ;;  %v1180_v10 = vsel %vm1179_vm7, %v1177_v22, %v1174_v44  ;;  %vm871_vm15 = vcmp.ne.f32.partialorder %v3934_v3, %v3934_v3 }
 0x167   : > { %v3946_v37 = vpop.f32.mrf.mxu2  ;;  %v1186_v63 = vmul.f32 %v3069_v15, %v1185_v13  ;;  %v1883_v15 = vld [vmem:[#allocation3 + $0xc0] sm:$0xff]  ;;  %v1348_v29 = vadd.f32 %v1180_v10, %v836_v19 }
 0x168   : > { %v967_v41 = vsub.f32 0.0, %v935_v57  ;;  %v3972_v57 = vpop.permute.xlu1 %1792  ;;  %vm2011_vm11 = vcmp.eq.s32.totalorder %v3885_v52, %v1883_v15  ;;  %v3998_v19 = vpop.permute.xlu2 %1782 }
 0x169   : > { %v1380_v21 = vsel %vm868_vm12, %v3876_v8, %v1348_v29 }
 0x16a   : > { %v3954_v58 = vpop.eup %3072  ;;  %v1016_v59 = vmul.f32 1.442695, %v967_v41 }
 0x16b   : > { %v3075_v36 = vpop.eup %3074  ;;  %v787_v33 = vpop.f32.mrf.mxu0  ;;  %v1190_v1 = vadd.f32 1.0, %v3954_v58  ;;  %v1193_v56 = vmul.f32 -0.5, %v3954_v58  ;;  %v1196_v8 = vand.u32 2147483647, %v3954_v58 }
 0x16c   : > { %3076 = vpow2.f32 %v1016_v59  ;;  %v3958_v27 = vadd.f32 %v3873_v23, %v787_v33  ;;  %2817 = vmatmul.msk.bf16.gmra.mxu2 %vm2100_vm4, %v2094_v11  ;;  %v1183_v55 = vmul.f32 0.6931472, %v3075_v36  ;;  %v2798_v11 = vsel %vm2011_vm11, 1.0, %v3163_v12  ;;  %v3992_v22 = vpop.permute.xlu0 %1687 }
 0x16d   : > { %3078 = vlog2.f32 %v1190_v1  ;;  %v2724_v36 = vadd.f32 -0.6931472, %v1380_v21  ;;  %vm1197_vm13 = vcmp.lt.f32.partialorder %v1196_v8, 0.0004427343 }
 0x16e   : > { %1552 = vmatmul.bf16.gmra.mxu1 %v1436_v28  ;;  %v936_v2 = vand.u32 2147483647, %v3958_v27  ;;  %v1189_v7 = vsel %vm1188_vm8, %v1186_v63, %v1183_v55  ;;  %v1194_v28 = vadd.f32 1.0, %v1193_v56  ;;  %vm872_vm8 = vcmp.ne.f32.partialorder %v3958_v27, %v3958_v27 }
 0x16f   : > { %v3967_v0 = vpop.f32.mrf.mxu2  ;;  %v1349_v5 = vadd.f32 %v1189_v7, %v837_v16 }
 0x170   : > { %v968_v61 = vsub.f32 0.0, %v936_v2  ;;  %v1195_v6 = vmul.f32 %v3954_v58, %v1194_v28 }
 0x171   : > { %v1381_v35 = vsel %vm869_vm10, %v3896_v46, %v1349_v5  ;;  %v2799_v46 = vsel %vm2012_vm9, 1.0, %v3163_v12  ;;  %v4000_v5 = vpop.permute.xlu1 %1777 }
 0x172   : > { %v3077_v60 = vpop.eup %3076  ;;  %v1018_v17 = vmul.f32 1.442695, %v968_v61  ;;  %v2725_v52 = vadd.f32 -0.6931472, %v1381_v35  ;;  %v2095_v16 = vpack.c.bf16 %v2799_v46, %v2798_v11  ;;  %v1885_v46 = vld [vmem:[#allocation3 + $0xd0] sm:$0xff] }
 0x173   : > { %v789_v24 = vpop.f32.mrf.mxu0  ;;  %v1199_v41 = vadd.f32 1.0, %v3077_v60  ;;  %v1202_v13 = vmul.f32 -0.5, %v3077_v60  ;;  %v3079_v25 = vpop.eup %3078  ;;  %v1205_v55 = vand.u32 2147483647, %v3077_v60  ;;  %vm2013_vm2 = vcmp.eq.s32.totalorder %v3812_v39, %v1885_v46 }
 0x174   : > { %3080 = vpow2.f32 %v1018_v17  ;;  %v3980_v54 = vadd.f32 %v3873_v23, %v789_v24  ;;  %v1437_v2 = vpack.c.bf16 %v2725_v52, %v2724_v36  ;;  %v1192_v32 = vmul.f32 0.6931472, %v3079_v25  ;;  %v4015_v28 = vpop.permute.xlu0 %1682 }
 0x175   : > { %3082 = vlog2.f32 %v1199_v41  ;;  %v1203_v33 = vadd.f32 1.0, %v1202_v13  ;;  %v839_v17 = vmax.f32 %v3934_v3, 0.0  ;;  %vm1206_vm14 = vcmp.lt.f32.partialorder %v1205_v55, 0.0004427343 }
 0x176   : > { %v937_v51 = vand.u32 2147483647, %v3980_v54  ;;  %v1198_v35 = vsel %vm1197_vm13, %v1195_v6, %v1192_v32  ;;  %v838_v41 = vmax.f32 %v3915_v42, 0.0  ;;  %v2800_v39 = vsel %vm2013_vm2, 1.0, %v3163_v12 }
 0x177   : > { %v3990_v59 = vpop.f32.mrf.mxu2  ;;  %v1204_v29 = vmul.f32 %v3077_v60, %v1203_v33  ;;  %vm873_vm6 = vcmp.ne.f32.partialorder %v3980_v54, %v3980_v54 }
 0x178   : > { %v969_v44 = vsub.f32 0.0, %v937_v51  ;;  %v1886_v51 = vld [vmem:[#allocation3 + $0xd8] sm:$0xff]  ;;  %v1350_v25 = vadd.f32 %v1198_v35, %v838_v41 }
 0x179   : > { %vm2014_vm0 = vcmp.eq.s32.totalorder %v3911_v34, %v1886_v51  ;;  %v4028_v32 = vpop.permute.xlu1 %1652  ;;  %v4040_v35 = vld [vmem:[%s4399_s8] ss:$0 sm:$0xff] }
 0x17a   : > { %v3995_v63 = vpop.eup %3080  ;;  %v1020_v1 = vmul.f32 1.442695, %v969_v44  ;;  %v2801_v6 = vsel %vm2014_vm0, 1.0, %v3163_v12 }
 0x17b   : > { %v3083_v10 = vpop.eup %3082  ;;  %v792_v7 = vpop.f32.mrf.mxu0  ;;  %v1208_v24 = vadd.f32 1.0, %v3995_v63  ;;  %v1211_v33 = vmul.f32 -0.5, %v3995_v63  ;;  %v2096_v34 = vpack.c.bf16 %v2801_v6, %v2800_v39 }
 0x17c   : > { %3084 = vpow2.f32 %v1020_v1  ;;  %v4003_v15 = vadd.f32 %v3873_v23, %v792_v7  ;;  %2818 = vmatmul.msk.bf16.gmra.mxu2 %vm2100_vm4, %v2095_v16  ;;  %v1201_v61 = vmul.f32 0.6931472, %v3083_v10  ;;  %v1382_v1 = vsel %vm870_vm1, %v3915_v42, %v1350_v25 }
 0x17d   : > { %3086 = vlog2.f32 %v1208_v24  ;;  %v2726_v24 = vadd.f32 -0.6931472, %v1382_v1  ;;  %v4051_v1 = vpop.permute.xlu0 %1787 }
 0x17e   : > { %1557 = vmatmul.bf16.gmra.mxu1 %v1437_v2  ;;  %v938_v58 = vand.u32 2147483647, %v4003_v15  ;;  %v1207_v56 = vsel %vm1206_vm14, %v1204_v29, %v1201_v61  ;;  %v4026_v2 = vpop.permute.xlu2 %1767  ;;  %vm874_vm14 = vcmp.ne.f32.partialorder %v4003_v15, %v4003_v15 }
 0x17f   : > { %v4010_v13 = vpop.f32.mrf.mxu2  ;;  %v1351_v21 = vadd.f32 %v1207_v56, %v839_v17  ;;  %v1212_v17 = vadd.f32 1.0, %v1211_v33  ;;  %v1214_v56 = vand.u32 2147483647, %v3995_v63 }
 0x180   : > { %v970_v52 = vsub.f32 0.0, %v938_v58 }
 0x181   : > { %v1383_v36 = vsel %vm871_vm15, %v3934_v3, %v1351_v21  ;;  %vm4055_vm3 = vcmp.lt.f32.partialorder %v1214_v56, 0.0004427343 }
 0x182   : > { %v3085_v60 = vpop.eup %3084  ;;  %v1022_v11 = vmul.f32 1.442695, %v970_v52  ;;  %v2727_v10 = vadd.f32 -0.6931472, %v1383_v36 }
 0x183   : > { %v794_v44 = vpop.f32.mrf.mxu0  ;;  %v1217_v8 = vadd.f32 1.0, %v3085_v60  ;;  %v1220_v16 = vmul.f32 -0.5, %v3085_v60  ;;  %v3087_v7 = vpop.eup %3086  ;;  %v1223_v41 = vand.u32 2147483647, %v3085_v60 }
 0x184   : > { %3088 = vpow2.f32 %v1022_v11  ;;  %v4020_v55 = vadd.f32 %v3873_v23, %v794_v44  ;;  %v1523_v61 = vpop.f32.mrf.mxu1  ;;  %v1438_v52 = vpack.c.bf16 %v2727_v10, %v2726_v24  ;;  %v1210_v25 = vmul.f32 0.6931472, %v3087_v7 }
 0x185   : > { %3090 = vlog2.f32 %v1217_v8  ;;  %v1221_v58 = vadd.f32 1.0, %v1220_v16  ;;  %v1213_v44 = vmul.f32 %v3995_v63, %v1212_v17  ;;  %v1524_v10 = vadd.f32 %v4040_v35, %v1523_v61  ;;  %v1887_v61 = vld [vmem:[#allocation3 + $0xe0] sm:$0xff] }
 0x186   : > { %v939_v3 = vand.u32 2147483647, %v4020_v55  ;;  %vm1224_vm5 = vcmp.lt.f32.partialorder %v1223_v41, 0.0004427343  ;;  %v1643_v41 = vpop.permute.xlu2 %1642  ;;  %vm2015_vm7 = vcmp.eq.s32.totalorder %v3842_v49, %v1887_v61  ;;  %vm875_vm15 = vcmp.ne.f32.partialorder %v4020_v55, %v4020_v55 }
 0x187   : > { %v4034_v29 = vpop.f32.mrf.mxu2  ;;  %v1222_v16 = vmul.f32 %v3085_v60, %v1221_v58  ;;  %v1216_v6 = vsel %vm4055_vm3, %v1213_v44, %v1210_v25  ;;  %v840_v60 = vmax.f32 %v3958_v27, 0.0  ;;  %v1638_v58 = vpop.permute.xlu1 %1637 }
 0x188   : > { %v971_v42 = vsub.f32 0.0, %v939_v3  ;;  %v841_v3 = vmax.f32 %v3980_v54, 0.0 }
 0x18a   : > { %v4043_v21 = vpop.eup %3088  ;;  %v1024_v51 = vmul.f32 1.442695, %v971_v42 }
 0x18b   : > { %v3091_v46 = vpop.eup %3090  ;;  %v797_v11 = vpop.f32.mrf.mxu0  ;;  %v1226_v36 = vadd.f32 1.0, %v4043_v21 }
 0x18c   : > { %3092 = vpow2.f32 %v1024_v51  ;;  %v4048_v33 = vadd.f32 %v3873_v23, %v797_v11  ;;  %2819 = vmatmul.msk.bf16.gmra.mxu2 %vm2100_vm4, %v2096_v34  ;;  %v1219_v8 = vmul.f32 0.6931472, %v3091_v46  ;;  %v1525_v39 = vpop.f32.mrf.mxu1  ;;  %v1795_v51 = vmul.f32 %v1638_v58, %v1524_v10 }
 0x18d   : > { %3094 = vlog2.f32 %v1226_v36  ;;  %v1526_v34 = vadd.f32 %v4040_v35, %v1525_v39  ;;  %v1229_v46 = vmul.f32 -0.5, %v4043_v21  ;;  %v1888_v36 = vld [vmem:[#allocation3 + $0xe8] sm:$0xff]  ;;  %v1232_v58 = vand.u32 2147483647, %v4043_v21 }
 0x18e   : > { %1562 = vmatmul.bf16.gmra.mxu1 %v1438_v52  ;;  %v940_v63 = vand.u32 2147483647, %v4048_v33  ;;  %v1225_v17 = vsel %vm1224_vm5, %v1222_v16, %v1219_v8  ;;  %v1352_v52 = vadd.f32 %v1216_v6, %v840_v60  ;;  %vm2016_vm9 = vcmp.eq.s32.totalorder %v3840_v14, %v1888_v36 }
 0x18f   : > { %v4063_v42 = vpop.f32.mrf.mxu2  ;;  %v1353_v24 = vadd.f32 %v1225_v17, %v841_v3  ;;  %v1796_v44 = vmul.f32 %v1643_v41, %v1526_v34  ;;  %v4080_v17 = vmul.f32 %v3838_v47, %v1795_v51  ;;  %v1230_v39 = vadd.f32 1.0, %v1229_v46 }
 0x190   : > { %v972_v56 = vsub.f32 0.0, %v940_v63  ;;  %v1384_v60 = vsel %vm872_vm8, %v3958_v27, %v1352_v52  ;;  %v2803_v52 = vsel %vm2016_vm9, 1.0, %v3163_v12  ;;  %vm4099_vm10 = vcmp.lt.f32.partialorder %v1232_v58, 0.0004427343 }
 0x191   : > { %v1385_v16 = vsel %vm873_vm6, %v3980_v54, %v1353_v24  ;;  %v4074_v7 = vmul.f32 %v3860_v50, %v1796_v44  ;;  %v2802_v50 = vsel %vm2015_vm7, 1.0, %v3163_v12  ;;  %v2728_v51 = vadd.f32 -0.6931472, %v1384_v60 }
 0x192   : > { %v3093_v11 = vpop.eup %3092  ;;  %v1026_v25 = vmul.f32 1.442695, %v972_v56  ;;  %v2729_v24 = vadd.f32 -0.6931472, %v1385_v16  ;;  %v4089_v56 = vpop.permute.xlu0 %1662  ;;  %v2097_v49 = vpack.c.bf16 %v2803_v52, %v2802_v50  ;;  %v1890_v50 = vld [vmem:[#allocation3 + $0xf8] sm:$0xff]  ;;  %vm876_vm2 = vcmp.ne.f32.partialorder %v4048_v33, %v4048_v33 }
 0x193   : > { %v799_v8 = vpop.f32.mrf.mxu0  ;;  %v1235_v3 = vadd.f32 1.0, %v3093_v11  ;;  %v3095_v10 = vpop.eup %3094  ;;  %v1238_v6 = vmul.f32 -0.5, %v3093_v11  ;;  %v1241_v44 = vand.u32 2147483647, %v3093_v11  ;;  %vm2018_vm12 = vcmp.eq.s32.totalorder %v3867_v40, %v1890_v50 }
 0x194   : > { %3096 = vpow2.f32 %v1026_v25  ;;  %v4077_v63 = vadd.f32 %v3873_v23, %v799_v8  ;;  %v1228_v47 = vmul.f32 0.6931472, %v3095_v10  ;;  %v1231_v25 = vmul.f32 %v4043_v21, %v1230_v39 }
 0x195   : > { %3098 = vlog2.f32 %v1235_v3  ;;  %v1239_v14 = vadd.f32 1.0, %v1238_v6  ;;  %v1528_v46 = vpop.f32.mrf.mxu1  ;;  %v1439_v8 = vpack.c.bf16 %v2729_v24, %v2728_v51  ;;  %v843_v24 = vmax.f32 %v4020_v55, 0.0 }
 0x196   : > { %v941_v54 = vand.u32 2147483647, %v4077_v63  ;;  %v1234_v6 = vsel %vm4099_vm10, %v1231_v25, %v1228_v47  ;;  %vm1242_vm11 = vcmp.lt.f32.partialorder %v1241_v44, 0.0004427343  ;;  %v1529_v51 = vadd.f32 %v4040_v35, %v1528_v46 }
 0x197   : > { %v4091_v34 = vpop.f32.mrf.mxu2  ;;  %v1240_v39 = vmul.f32 %v3093_v11, %v1239_v14 }
 0x198   : > { %v973_v41 = vsub.f32 0.0, %v941_v54  ;;  %v842_v54 = vmax.f32 %v4003_v15, 0.0 }
 0x19a   : > { %v4097_v36 = vpop.eup %3096  ;;  %v1028_v61 = vmul.f32 1.442695, %v973_v41  ;;  %v1889_v41 = vld [vmem:[#allocation3 + $0xf0] sm:$0xff]  ;;  %v1648_v14 = vpop.permute.xlu0 %1647 }
 0x19b   : > { %v3099_v3 = vpop.eup %3098  ;;  %v802_v10 = vpop.f32.mrf.mxu0  ;;  %v1244_v58 = vadd.f32 1.0, %v4097_v36  ;;  %vm2017_vm13 = vcmp.eq.s32.totalorder %v3938_v30, %v1889_v41 }
 0x19c   : > { %3100 = vpow2.f32 %v1028_v61  ;;  %v4106_v60 = vadd.f32 %v3873_v23, %v802_v10  ;;  %2820 = vmatmul.msk.bf16.gmra.mxu2 %vm2100_vm4, %v2097_v49  ;;  %v1237_v21 = vmul.f32 0.6931472, %v3099_v3  ;;  %v1354_v49 = vadd.f32 %v1234_v6, %v842_v54 }
 0x19d   : > { %v1530_v44 = vpop.f32.mrf.mxu1  ;;  %3102 = vlog2.f32 %v1244_v58 }
 0x19e   : > { %1567 = vmatmul.bf16.gmra.mxu1 %v1439_v8  ;;  %v942_v47 = vand.u32 2147483647, %v4106_v60  ;;  %v1243_v52 = vsel %vm1242_vm11, %v1240_v39, %v1237_v21  ;;  %v1797_v8 = vmul.f32 %v1648_v14, %v1529_v51  ;;  %v1531_v3 = vadd.f32 %v4040_v35, %v1530_v44 }
 0x19f   : > { %v4114_v25 = vpop.f32.mrf.mxu2  ;;  %v1355_v61 = vadd.f32 %v1243_v52, %v843_v24  ;;  %v1386_v6 = vsel %vm874_vm14, %v4003_v15, %v1354_v49  ;;  %v1247_v39 = vmul.f32 -0.5, %v4097_v36  ;;  %vm878_vm7 = vcmp.ne.f32.partialorder %v4106_v60, %v4106_v60 }
 0x1a0   : > { %v974_v11 = vsub.f32 0.0, %v942_v47  ;;  %v1798_v24 = vmul.f32 %v4028_v32, %v1531_v3  ;;  %v4131_v47 = vmul.f32 %v3883_v53, %v1797_v8  ;;  %v2730_v32 = vadd.f32 -0.6931472, %v1386_v6 }
 0x1a1   : > { %v1387_v21 = vsel %vm875_vm15, %v4020_v55, %v1355_v61  ;;  %v2805_v61 = vsel %vm2018_vm12, 1.0, %v3163_v12  ;;  %v1248_v14 = vadd.f32 1.0, %v1247_v39  ;;  %v845_v39 = vmax.f32 %v4077_v63, 0.0 }
 0x1a2   : > { %v3101_v46 = vpop.eup %3100  ;;  %v1030_v16 = vmul.f32 1.442695, %v974_v11  ;;  %v4134_v52 = vmul.f32 %v3905_v18, %v1798_v24  ;;  %v2731_v55 = vadd.f32 -0.6931472, %v1387_v21 }
 0x1a3   : > { %v804_v10 = vpop.f32.mrf.mxu0  ;;  %v1253_v54 = vadd.f32 1.0, %v3101_v46  ;;  %v1256_v51 = vmul.f32 -0.5, %v3101_v46  ;;  %v3103_v49 = vpop.eup %3102  ;;  %v1259_v3 = vand.u32 2147483647, %v3101_v46 }
 0x1a4   : > { %3104 = vpow2.f32 %v1030_v16  ;;  %v4128_v58 = vadd.f32 %v3873_v23, %v804_v10  ;;  %v2804_v23 = vsel %vm2017_vm13, 1.0, %v3163_v12  ;;  %v1250_v16 = vand.u32 2147483647, %v4097_v36 }
 0x1a5   : > { %3106 = vlog2.f32 %v1253_v54  ;;  %v1257_v44 = vadd.f32 1.0, %v1256_v51  ;;  %v1533_v8 = vpop.f32.mrf.mxu1  ;;  %v2098_v40 = vpack.c.bf16 %v2805_v61, %v2804_v23  ;;  %v1440_v21 = vpack.c.bf16 %v2731_v55, %v2730_v32 }
 0x1a6   : > { %v943_v15 = vand.u32 2147483647, %v4128_v58  ;;  %v1246_v54 = vmul.f32 0.6931472, %v3103_v49  ;;  %v1249_v12 = vmul.f32 %v4097_v36, %v1248_v14  ;;  %vm1251_vm0 = vcmp.lt.f32.partialorder %v1250_v16, 0.0004427343 }
 0x1a7   : > { %v4143_v11 = vpop.f32.mrf.mxu2  ;;  %v1258_v6 = vmul.f32 %v3101_v46, %v1257_v44  ;;  %vm1260_vm1 = vcmp.lt.f32.partialorder %v1259_v3, 0.0004427343  ;;  %v1534_v51 = vadd.f32 %v4040_v35, %v1533_v8  ;;  %v844_v55 = vmax.f32 %v4048_v33, 0.0 }
 0x1a8   : > { %v975_v53 = vsub.f32 0.0, %v943_v15  ;;  %v1252_v15 = vsel %vm1251_vm0, %v1249_v12, %v1246_v54  ;;  %vm879_vm6 = vcmp.ne.f32.partialorder %v4128_v58, %v4128_v58 }
 0x1a9   : > { %v1356_v36 = vadd.f32 %v1252_v15, %v844_v55  ;;  %v1799_v46 = vmul.f32 %v3970_v26, %v1534_v51 }
 0x1aa   : > { %v3105_v10 = vpop.eup %3104  ;;  %v1032_v50 = vmul.f32 1.442695, %v975_v53 }
 0x1ab   : > { %v3107_v30 = vpop.eup %3106  ;;  %v1262_v24 = vadd.f32 1.0, %v3105_v10  ;;  %v1265_v16 = vmul.f32 -0.5, %v3105_v10  ;;  %v4165_v26 = vmul.f32 %v3926_v43, %v1799_v46  ;;  %v846_v46 = vmax.f32 %v4106_v60, 0.0 }
 0x1ac   : > { %3108 = vpow2.f32 %v1032_v50  ;;  %2821 = vmatmul.msk.bf16.gmra.mxu2 %vm2100_vm4, %v2098_v40  ;;  %v1255_v41 = vmul.f32 0.6931472, %v3107_v30  ;;  %vm877_vm4 = vcmp.ne.f32.partialorder %v4077_v63, %v4077_v63  ;;  %v1388_v50 = vsel %vm876_vm2, %v4048_v33, %v1356_v36 }
 0x1ad   : > { %3110 = vlog2.f32 %v1262_v24  ;;  %v1535_v32 = vpop.f32.mrf.mxu1 }
 0x1ae   : > { %1572 = vmatmul.bf16.gmra.mxu1 %v1440_v21  ;;  %v1261_v61 = vsel %vm1260_vm1, %v1258_v6, %v1255_v41  ;;  %v1536_v14 = vadd.f32 %v4040_v35, %v1535_v32  ;;  %v2732_v6 = vadd.f32 -0.6931472, %v1388_v50 }
 0x1af   : > { %v4153_v49 = vpop.f32.mrf.mxu2  ;;  %v1357_v23 = vadd.f32 %v1261_v61, %v845_v39  ;;  %v1268_v39 = vand.u32 2147483647, %v3105_v10 }
 0x1b0   : > { %v1800_v40 = vmul.f32 %v4089_v56, %v1536_v14 }
 0x1b1   : > { %v1389_v8 = vsel %vm877_vm4, %v4077_v63, %v1357_v23  ;;  %v1266_v63 = vadd.f32 1.0, %v1265_v16  ;;  %vm1269_vm3 = vcmp.lt.f32.partialorder %v1268_v39, 0.0004427343  ;;  %v847_v23 = vmax.f32 %v4128_v58, 0.0 }
 0x1b2   : > { %v3109_v53 = vpop.eup %3108  ;;  %v4168_v21 = vmul.f32 %v3946_v37, %v1800_v40  ;;  %v2733_v54 = vadd.f32 -0.6931472, %v1389_v8 }
 0x1b3   : > { %v1271_v44 = vadd.f32 1.0, %v3109_v53  ;;  %v1274_v3 = vmul.f32 -0.5, %v3109_v53  ;;  %v3111_v30 = vpop.eup %3110  ;;  %v1277_v24 = vand.u32 2147483647, %v3109_v53  ;;  %v1267_v61 = vmul.f32 %v3105_v10, %v1266_v63 }
 0x1b4   : > { %v2290_v56 = vpack.c.bf16 %v4168_v21, %v4165_v26  ;;  %v1264_v51 = vmul.f32 0.6931472, %v3111_v30  ;;  %v1441_v33 = vpack.c.bf16 %v2733_v54, %v2732_v6 }
 0x1b5   : > { %3112 = vlog2.f32 %v1271_v44  ;;  %v1275_v41 = vadd.f32 1.0, %v1274_v3  ;;  %vm1278_vm5 = vcmp.lt.f32.partialorder %v1277_v24, 0.0004427343 }
 0x1b6   : > { %v1270_v32 = vsel %vm1269_vm3, %v1267_v61, %v1264_v51  ;;  %v4206_v61 = vpop.permute.xlu0 %1772 }
 0x1b7   : > { %v4170_v12 = vpop.f32.mrf.mxu2  ;;  %v1276_v37 = vmul.f32 %v3109_v53, %v1275_v41  ;;  %v1358_v16 = vadd.f32 %v1270_v32, %v846_v46  ;;  %v4214_v46 = vpop.f32.mrf.mxu3 }
 0x1b9   : > { %v1390_v50 = vsel %vm878_vm7, %v4106_v60, %v1358_v16 }
 0x1bb   : > { %v3113_v15 = vpop.eup %3112  ;;  %v1538_v43 = vpop.f32.mrf.mxu1 }
 0x1bc   : > { %v1273_v55 = vmul.f32 0.6931472, %v3113_v15  ;;  %v1539_v8 = vadd.f32 %v4040_v35, %v1538_v43 }
 0x1be   : > { %v1279_v36 = vsel %vm1278_vm5, %v1276_v37, %v1273_v55  ;;  %1577 = vmatmul.bf16.gmra.mxu1 %v1441_v33  ;;  %v1801_v3 = vmul.f32 %v3950_v31, %v1539_v8 }
 0x1bf   : > { %v1359_v14 = vadd.f32 %v1279_v36, %v847_v23  ;;  %v4176_v44 = vpop.f32.mrf.mxu2  ;;  %v4210_v23 = vpop.permute.xlu0 %1757 }
 0x1c0   : > { %v4191_v41 = vmul.f32 %v3967_v0, %v1801_v3  ;;  %v4230_v27 = vpop.f32.mrf.mxu3 }
 0x1c1   : > { %v1391_v53 = vsel %vm879_vm6, %v4128_v58, %v1359_v14  ;;  %v2734_v58 = vadd.f32 -0.6931472, %v1390_v50  ;;  %v4216_v14 = vpop.permute.xlu2 %1747 }
 0x1c2   : > { %v2735_v30 = vadd.f32 -0.6931472, %v1391_v53 }
 0x1c3   : > { %v1540_v10 = vpop.f32.mrf.mxu1 }
 0x1c4   : > { %v1541_v40 = vadd.f32 %v4040_v35, %v1540_v10  ;;  %v1442_v31 = vpack.c.bf16 %v2735_v30, %v2734_v58 }
 0x1c6   : > { %v1802_v54 = vmul.f32 %v3948_v4, %v1541_v40 }
 0x1c7   : > { %v4188_v63 = vpop.f32.mrf.mxu2  ;;  %v4221_v10 = vpop.permute.xlu0 %1752 }
 0x1c8   : > { %v4194_v6 = vmul.f32 %v3990_v59, %v1802_v54 }
 0x1ca   : > { %v2291_v39 = vpack.c.bf16 %v4194_v6, %v4191_v41 }
 0x1cb   : > { %v1543_v24 = vpop.f32.mrf.mxu1 }
 0x1ce   : > { %1582 = vmatmul.bf16.gmra.mxu1 %v1442_v31 }
 0x1cf   : > { %v4198_v51 = vpop.f32.mrf.mxu2 }
 0x1d3   : > { %v1545_v60 = vpop.f32.mrf.mxu1 }
 0x1d7   : > { %v4200_v4 = vpop.f32.mrf.mxu2 }
 0x1db   : > { %v1548_v33 = vpop.f32.mrf.mxu1 }
 0x1dc   : > { %v1549_v18 = vadd.f32 %v4040_v35, %v1548_v33  ;;  %v1544_v33 = vadd.f32 %v4040_v35, %v1543_v24  ;;  %v1593_v24 = vpop.f32.mrf.mxu3 }
 0x1df   : > { %v4202_v15 = vpop.f32.mrf.mxu2 }
 0x1e3   : > { %v1550_v0 = vpop.f32.mrf.mxu1 }
 0x1e4   : > { %v1551_v30 = vadd.f32 %v4040_v35, %v1550_v0  ;;  %v1546_v0 = vadd.f32 %v4040_v35, %v1545_v60 }
 0x1e7   : > { %v4204_v43 = vpop.f32.mrf.mxu2 }
 0x1eb   : > { %v1553_v59 = vpop.f32.mrf.mxu1 }
 0x1ec   : > { %v1554_v40 = vadd.f32 %v4040_v35, %v1553_v59 }
 0x1ef   : > { %v4208_v55 = vpop.f32.mrf.mxu2 }
 0x1f3   : > { %v1555_v37 = vpop.f32.mrf.mxu1 }
 0x1f4   : > { %v1556_v53 = vadd.f32 %v4040_v35, %v1555_v37  ;;  %v1807_v37 = vmul.f32 %v3893_v45, %v1554_v40  ;;  %v1805_v45 = vmul.f32 %v3992_v22, %v1549_v18 }
 0x1f6   : > { %v1808_v58 = vmul.f32 %v3891_v20, %v1556_v53  ;;  %v1806_v20 = vmul.f32 %v3922_v38, %v1551_v30  ;;  %v1803_v38 = vmul.f32 %v3920_v62, %v1544_v33  ;;  %v4432_v33 = vpack.c.bf16 %v4074_v7, %v4080_v17 }
 0x1f7   : > { %v4212_v32 = vpop.f32.mrf.mxu2  ;;  %v1591_v7 = vadd.f32 %v4040_v35, %v4230_v27 }
 0x1f8   : > { %v2253_v40 = vmul.f32 %v4091_v34, %v1806_v20  ;;  %v1595_v20 = vpop.f32.mrf.mxu3 }
 0x1fb   : > { %v1558_v36 = vpop.f32.mrf.mxu1 }
 0x1fc   : > { %v1559_v16 = vadd.f32 %v4040_v35, %v1558_v36 }
 0x1fe   : > { %v1809_v50 = vmul.f32 %v3865_v9, %v1559_v16  ;;  %v4238_v16 = vpop.permute.xlu2 %1742 }
 0x1ff   : > { %v4218_v8 = vpop.f32.mrf.mxu2 }
 0x200   : > { %v2256_v59 = vmul.f32 %v4153_v49, %v1809_v50  ;;  %v2254_v49 = vmul.f32 %v4114_v25, %v1807_v37 }
 0x203   : > { %v1560_v3 = vpop.f32.mrf.mxu1 }
 0x204   : > { %v1561_v54 = vadd.f32 %v4040_v35, %v1560_v3  ;;  %v4243_v3 = vpop.permute.xlu0 %1727 }
 0x206   : > { %v1810_v31 = vmul.f32 %v3964_v48, %v1561_v54  ;;  %v2255_v48 = vmul.f32 %v4143_v11, %v1808_v58  ;;  %v2252_v11 = vmul.f32 %v4063_v42, %v1805_v45  ;;  %v1718_v25 = vpop.permute.xlu2 %1717 }
 0x207   : > { %v4232_v36 = vpop.f32.mrf.mxu2 }
 0x208   : > { %v2257_v9 = vmul.f32 %v4170_v12, %v1810_v31  ;;  %v1804_v12 = vmul.f32 %v4015_v28, %v1546_v0  ;;  %v2294_v60 = vpack.c.bf16 %v2255_v48, %v2254_v49  ;;  %v2293_v18 = vpack.c.bf16 %v2253_v40, %v2252_v11  ;;  %v2275_v11 = vld [vmem:[#allocation4] sm:$0xff] }
 0x209   : > { %v2250_v28 = vmul.f32 %v4010_v13, %v1803_v38  ;;  %v4294_v38 = vld [vmem:[%s472_s14] sm:$0x3] }
 0x20a   : > { %v2295_v53 = vpack.c.bf16 %v2257_v9, %v2256_v59  ;;  %v2251_v22 = vmul.f32 %v4034_v29, %v1804_v12 }
 0x20b   : > { %v1563_v54 = vpop.f32.mrf.mxu1 }
 0x20c   : > { %2304 = vmatpush.bf16.msra.mxu3 %v2295_v53  ;;  %v1564_v30 = vadd.f32 %v4040_v35, %v1563_v54  ;;  %v1723_v37 = vpop.permute.xlu0 %1722  ;;  %v2292_v62 = vpack.c.bf16 %v2251_v22, %v2250_v28  ;;  %v1598_v53 = vpop.f32.mrf.mxu3 }
 0x20e   : > { %v1811_v31 = vmul.f32 %v1718_v25, %v1564_v30  ;;  %v3164_v25 = vmov 1.0|1.0  }
 0x20f   : > { %v4250_v50 = vpop.f32.mrf.mxu2 }
 0x210   : > { %2305 = vmatpush.bf16.msra.mxu3 %v2294_v60  ;;  %v4259_v42 = vmul.f32 %v4176_v44, %v1811_v31 }
 0x213   : > { %v1565_v58 = vpop.f32.mrf.mxu1 }
 0x214   : > { %v1566_v34 = vadd.f32 %v4040_v35, %v1565_v58  ;;  %2306 = vmatpush.bf16.msra.mxu3 %v2293_v18  ;;  %v1600_v41 = vpop.f32.mrf.mxu3 }
 0x215   : > { %v1601_v26 = vadd.f32 %v4040_v35, %v1600_v41 }
 0x216   : > { %v1812_v59 = vmul.f32 %v1723_v37, %v1566_v34  ;;  %v1763_v37 = vpop.permute.xlu1 %1762 }
 0x217   : > { %v2229_v9 = vpop.f32.mrf.mxu2  ;;  %v1826_v49 = vmul.f32 %v3972_v57, %v1601_v26  ;;  %v2277_v57 = vperm.slane %v4294_v38, 0 }
 0x218   : > { %v4262_v0 = vmul.f32 %v4188_v63, %v1812_v59  ;;  %2307 = vmatpush.bf16.msra.mxu3 %v2292_v62  ;;  %v4431_v63 = vpack.c.bf16 %v4134_v52, %v4131_v47  ;;  %v1594_v47 = vadd.f32 %v4040_v35, %v1593_v24 }
 0x219   : > { %vm2279_vm8 = vcmp.eq.s32.totalorder %v2277_v57, %v2275_v11 }
 0x21a   : > { %v2296_v29 = vpack.c.bf16 %v4262_v0, %v4259_v42  ;;  %v1823_v30 = vmul.f32 %v4000_v5, %v1594_v47  ;;  %vm2824_vm9 = vmpackc.low %vm2279_vm8, %vm2279_vm8 }
 0x21b   : > { %v4266_v13 = vpop.f32.mrf.mxu1 }
 0x21c   : > { %2308 = vmatpush.bf16.msra.mxu3 %v2291_v39  ;;  %v1599_v39 = vadd.f32 %v4040_v35, %v1598_v53 }
 0x21e   : > { %v1825_v52 = vmul.f32 %v4051_v1, %v1599_v39  ;;  %v1589_v1 = vadd.f32 %v4040_v35, %v4214_v46 }
 0x21f   : > { %v2232_v48 = vpop.f32.mrf.mxu2 }
 0x220   : > { %2309 = vmatpush.bf16.msra.mxu3 %v2290_v56  ;;  %v1596_v56 = vadd.f32 %v4040_v35, %v1595_v20  ;;  %v2270_v18 = vmul.f32 %v2232_v48, %v1823_v30  ;;  %v1821_v58 = vmul.f32 %v4026_v2, %v1589_v1  ;;  %v1738_v20 = vpop.permute.xlu1 %1737 }
 0x222   : > { %v1824_v17 = vmul.f32 %v3998_v19, %v1596_v56  ;;  %v1822_v19 = vmul.f32 %v4206_v61, %v1591_v7  ;;  %v2268_v46 = vmul.f32 %v4250_v50, %v1821_v58 }
 0x223   : > { %v1570_v44 = vpop.f32.mrf.mxu1 }
 0x224   : > { %2310 = vmatpush.bf16.msra.mxu3 %v4431_v63  ;;  %v2269_v28 = vmul.f32 %v2229_v9, %v1822_v19  ;;  %v1571_v26 = vadd.f32 %v4040_v35, %v1570_v44 }
 0x226   : > { %v2301_v34 = vpack.c.bf16 %v2269_v28, %v2268_v46 }
 0x227   : > { %v2234_v54 = vpop.f32.mrf.mxu2 }
 0x228   : > { %2311 = vmatpush.bf16.msra.mxu3 %v4432_v33  ;;  %v2271_v24 = vmul.f32 %v2234_v54, %v1824_v17 }
 0x22a   : > { %v2302_v31 = vpack.c.bf16 %v2271_v24, %v2270_v18 }
 0x22b   : > { %v1573_v45 = vpop.f32.mrf.mxu1  ;;  %2825 = vmatmul.msk.bf16.vlgmr.msra.gmra.mxu3 %vm2824_vm9, %v3164_v25 }
 0x22c   : > { %v1574_v33 = vadd.f32 %v4040_v35, %v1573_v45  ;;  %v1733_v45 = vpop.permute.xlu1 %1732 }
 0x22f   : > { %v2237_v6 = vpop.f32.mrf.mxu2 }
 0x230   : > { %v2272_v40 = vmul.f32 %v2237_v6, %v1825_v52 }
 0x233   : > { %v1575_v21 = vpop.f32.mrf.mxu1 }
 0x234   : > { %v1576_v50 = vadd.f32 %v4040_v35, %v1575_v21  ;;  %v1569_v21 = vadd.f32 %v4040_v35, %v4266_v13  ;;  %v2276_v13 = vld [vmem:[#allocation4 + $0x8] sm:$0xff] }
 0x236   : > { %v1816_v56 = vmul.f32 %v4238_v16, %v1576_v50 }
 0x237   : > { %v2239_v12 = vpop.f32.mrf.mxu2 }
 0x238   : > { %v2273_v60 = vmul.f32 %v2239_v12, %v1826_v49 }
 0x23a   : > { %v2303_v27 = vpack.c.bf16 %v2273_v60, %v2272_v40 }
 0x23b   : > { %v1578_v22 = vpop.f32.mrf.mxu1 }
 0x23c   : > { %2317 = vmatpush.bf16.msrb.mxu3 %v2303_v27  ;;  %v1579_v63 = vadd.f32 %v4040_v35, %v1578_v22 }
 0x23e   : > { %v1817_v41 = vmul.f32 %v4216_v14, %v1579_v63  ;;  %v1814_v14 = vmul.f32 %v1733_v45, %v1571_v26 }
 0x240   : > { %2318 = vmatpush.bf16.msrb.mxu3 %v2302_v31  ;;  %v2264_v52 = vmul.f32 %v4208_v55, %v1817_v41 }
 0x243   : > { %v1580_v5 = vpop.f32.mrf.mxu1 }
 0x244   : > { %2319 = vmatpush.bf16.msrb.mxu3 %v2301_v34  ;;  %v1581_v61 = vadd.f32 %v4040_v35, %v1580_v5 }
 0x246   : > { %v1818_v53 = vmul.f32 %v4221_v10, %v1581_v61  ;;  %v1815_v10 = vmul.f32 %v1738_v20, %v1574_v33 }
 0x248   : > { %v2262_v44 = vmul.f32 %v4202_v15, %v1815_v10 }
 0x24b   : > { %v1583_v59 = vpop.f32.mrf.mxu1 }
 0x24c   : > { %v1584_v62 = vadd.f32 %v4040_v35, %v1583_v59 }
 0x24e   : > { %v1819_v2 = vmul.f32 %v4210_v23, %v1584_v62  ;;  %v2265_v23 = vmul.f32 %v4212_v32, %v1818_v53  ;;  %v2261_v32 = vmul.f32 %v4200_v4, %v1814_v14 }
 0x250   : > { %v2266_v6 = vmul.f32 %v4218_v8, %v1819_v2  ;;  %v2263_v8 = vmul.f32 %v4204_v43, %v1816_v56  ;;  %v2299_v49 = vpack.c.bf16 %v2265_v23, %v2264_v52 }
 0x252   : > { %v2298_v16 = vpack.c.bf16 %v2263_v8, %v2262_v44 }
 0x253   : > { %v1585_v48 = vpop.f32.mrf.mxu1 }
 0x254   : > { %v1586_v9 = vadd.f32 %v4040_v35, %v1585_v48  ;;  %v2278_v35 = vperm.slane %v4294_v38, 1 }
 0x256   : > { %v1820_v54 = vmul.f32 %v1763_v37, %v1586_v9  ;;  %vm2280_vm10 = vcmp.eq.s32.totalorder %v2278_v35, %v2276_v13 }
 0x257   : > { %vm2826_vm11 = vmpackc.low %vm2280_vm10, %vm2280_vm10 }
 0x258   : > { %v2267_v39 = vmul.f32 %v4232_v36, %v1820_v54  ;;  %v1813_v36 = vmul.f32 %v4243_v3, %v1569_v21  ;;  %v2287_v3 = vld [vmem:[#allocation2] sm:$0xff] }
 0x25a   : > { %v2300_v47 = vpack.c.bf16 %v2267_v39, %v2266_v6  ;;  %v2260_v12 = vmul.f32 %v4198_v51, %v1813_v36 }
 0x25c   : > { %2320 = vmatpush.bf16.msrb.mxu3 %v2300_v47  ;;  %v2297_v55 = vpack.c.bf16 %v2261_v32, %v2260_v12 }
 0x260   : > { %2321 = vmatpush.bf16.msrb.mxu3 %v2299_v49 }
 0x264   : > { %2322 = vmatpush.bf16.msrb.mxu3 %v2298_v16 }
 0x268   : > { %2323 = vmatpush.bf16.msrb.mxu3 %v2297_v55 }
 0x26c   : > { %2324 = vmatpush.bf16.msrb.mxu3 %v2296_v29 }
 0x26f   : > { %2827 = vmatmul.msk.bf16.vlgmr.msrb.gmra.mxu3 %vm2826_vm11, %v3164_v25 }
 0x2ae   : > { %v2313_v15 = vpop.f32.mrf.mxu3 }
 0x2b6   : > { %v2315_v43 = vpop.f32.mrf.mxu3 }
 0x2f2   : > { %v2326_v4 = vpop.f32.mrf.mxu3 }
 0x2f3   : > { %v2327_v7 = vadd.f32 %v2326_v4, %v2313_v15 }
 0x2f5   : > { %v2330_v17 = vadd.f32 %v2327_v7, %v2287_v3 }
 0x2f6   : > { %2335 = sbr.rel (%p2828_p6) target bundleno = 1089 (0x441), region = 80 }
 0x2f7   : > { %2331 = vst [vmem:[#allocation2] sm:$0xff] %v2330_v17 }
 0x2fa   : > { %v2328_v51 = vpop.f32.mrf.mxu3 }
 0x2fb   : > { %v2937_v40 = vld [vmem:[%s4400_s9 + $0x38] sm:$0xff]  ;;  %v2936_v42 = vld [vmem:[%s4400_s9 + $0x30] sm:$0xff]  ;;  %v2935_v0 = vld [vmem:[%s4400_s9 + $0x28] sm:$0xff] }
 0x2fc   : > { %2406 = vmatpush.bf16.msra.mxu0 %v2937_v40  ;;  %v2934_v29 = vld [vmem:[%s4400_s9 + $0x20] sm:$0xff]  ;;  %v2933_v60 = vld [vmem:[%s4400_s9 + $0x18] sm:$0xff]  ;;  %v2932_v38 = vld [vmem:[%s4400_s9 + $0x10] sm:$0xff] }
 0x2fd   : > { %v2931_v11 = vld [vmem:[%s4400_s9 + $0x8] sm:$0xff]  ;;  %v2930_v1 = vld [vmem:[%s4400_s9] sm:$0xff]  ;;  %v2945_v24 = vld [vmem:[%s4402_s11 + $0x38] sm:$0xff] }
 0x2fe   : > { %v2336_v57 = vld [vmem:[#allocation2] sm:$0xff]  ;;  %2507 = vmatpush.bf16.msra.mxu1 %v2945_v24  ;;  %v2944_v27 = vld [vmem:[%s4402_s11 + $0x30] sm:$0xff]  ;;  %v2943_v22 = vld [vmem:[%s4402_s11 + $0x28] sm:$0xff] }
 0x2ff   : > { %v2337_v30 = vpack.c.bf16 %v2336_v57, %v2336_v57  ;;  %v2942_v19 = vld [vmem:[%s4402_s11 + $0x20] sm:$0xff]  ;;  %v2941_v18 = vld [vmem:[%s4402_s11 + $0x18] sm:$0xff]  ;;  %v2940_v25 = vld [vmem:[%s4402_s11 + $0x10] sm:$0xff] }
 0x300   : > { %2407 = vmatpush.bf16.msra.mxu0 %v2936_v42  ;;  %v2939_v58 = vld [vmem:[%s4402_s11 + $0x8] sm:$0xff]  ;;  %v2938_v28 = vld [vmem:[%s4402_s11] sm:$0xff] }
 0x301   : > { %v3115_v31 = vld [vmem:[%s4401_s10] ss:$0 sm:$0xff] }
 0x302   : > { %2508 = vmatpush.bf16.msra.mxu1 %v2944_v27  ;;  %v3116_v56 = vld [vmem:[%s4403_s12] ss:$0 sm:$0xff] }
 0x304   : > { %2408 = vmatpush.bf16.msra.mxu0 %v2935_v0 }
 0x306   : > { %2509 = vmatpush.bf16.msra.mxu1 %v2943_v22 }
 0x308   : > { %2409 = vmatpush.bf16.msra.mxu0 %v2934_v29 }
 0x30a   : > { %2510 = vmatpush.bf16.msra.mxu1 %v2942_v19 }
 0x30c   : > { %2410 = vmatpush.bf16.msra.mxu0 %v2933_v60 }
 0x30e   : > { %2511 = vmatpush.bf16.msra.mxu1 %v2941_v18 }
 0x310   : > { %2411 = vmatpush.bf16.msra.mxu0 %v2932_v38 }
 0x312   : > { %2512 = vmatpush.bf16.msra.mxu1 %v2940_v25 }
 0x314   : > { %2412 = vmatpush.bf16.msra.mxu0 %v2931_v11 }
 0x316   : > { %2513 = vmatpush.bf16.msra.mxu1 %v2939_v58 }
 0x318   : > { %2413 = vmatpush.bf16.msra.mxu0 %v2930_v1 }
 0x31a   : > { %2514 = vmatpush.bf16.msra.mxu1 %v2938_v28 }
 0x31b   : > { %2414 = vmatmul.bf16.vlgmr.msra.gmra.mxu0 %v2337_v30 }
 0x398   : > { %v2415_v46 = vpop.f32.mrf.mxu0 }
 0x399   : > { %v2416_v34 = vadd.f32 %v3115_v31, %v2415_v46 }
 0x39b   : > { %v2422_v5 = vand.u32 2147483647, %v2416_v34  ;;  %v2419_v54 = vmax.f32 %v2416_v34, 0.0  ;;  %vm2420_vm13 = vcmp.ne.f32.partialorder %v2416_v34, %v2416_v34 }
 0x39d   : > { %v2423_v37 = vsub.f32 0.0, %v2422_v5 }
 0x39f   : > { %v2424_v59 = vmul.f32 1.442695, %v2423_v37 }
 0x3a0   : > { %v2417_v62 = vpop.f32.mrf.mxu0 }
 0x3a1   : > { %3117 = vpow2.f32 %v2424_v59 }
 0x3a7   : > { %v3118_v61 = vpop.eup %3117 }
 0x3a8   : > { %v2426_v20 = vadd.f32 1.0, %v3118_v61  ;;  %v2429_v48 = vmul.f32 -0.5, %v3118_v61  ;;  %v2432_v2 = vand.u32 2147483647, %v3118_v61 }
 0x3aa   : > { %3119 = vlog2.f32 %v2426_v20  ;;  %v2430_v63 = vadd.f32 1.0, %v2429_v48  ;;  %vm2433_vm12 = vcmp.lt.f32.partialorder %v2432_v2, 0.0004427343 }
 0x3ac   : > { %v2431_v53 = vmul.f32 %v3118_v61, %v2430_v63 }
 0x3b0   : > { %v3120_v9 = vpop.eup %3119 }
 0x3b1   : > { %v2428_v50 = vmul.f32 0.6931472, %v3120_v9 }
 0x3b3   : > { %v2434_v33 = vsel %vm2433_vm12, %v2431_v53, %v2428_v50 }
 0x3b4   : > { %v2435_v41 = vadd.f32 %v2434_v33, %v2419_v54 }
 0x3b6   : > { %v2436_v6 = vsel %vm2420_vm13, %v2416_v34, %v2435_v41 }
 0x3b7   : > { %v2861_v39 = vadd.f32 -0.6931472, %v2436_v6 }
 0x3b9   : > { %v2438_v26 = vpack.c.bf16 %v2861_v39, %v2861_v39 }
 0x3bb   : > { %2515 = vmatmul.bf16.vlgmr.msra.gmra.mxu1 %v2438_v26 }
 0x438   : > { %v2516_v23 = vpop.f32.mrf.mxu1 }
 0x439   : > { %v2517_v47 = vadd.f32 %v3116_v56, %v2516_v23 }
 0x43b   : > { %2520 = vst [vmem:[#allocation5] sm:$0xff] %v2517_v47 }
 0x440   : > { %v2518_v21 = vpop.f32.mrf.mxu1 }
 0x441 PF: > { %p2966_p7 = scmp.eq.s32.totalorder %s3242_s26, 1  ;;  %s3165_s19 = smov [#allocation5]  }
 0x442   : > { %s2527_s20 = sshll.u32 %s3165_s19, 4  ;;  %s2529_s24 = sshll.u32 %s4404_s13, 4  ;;  %s2528_s20 = int_to_ptr.vmem [resolvable:$true] %s2527_s20  ;;  %s2530_s24 = int_to_ptr.hbm [resolvable:$true] %s2529_s24 }
 0x443   : > { %2963 = dma.vmem_to_hbm [thread:$0]  (%p2966_p7), %s2528_s20, 128, %s2530_s24, [#allocation6]  }
 0x444   : > { %3154 = dma.done.wait (%p2966_p7), [#allocation6], 128  }
 0x445   : > { %3156 = vsyncadd (%p2966_p7), [#allocation6], 4294967168 }
 0x446 PF: > { %s4433_s28 = sld [smem:[#allocation8_spill]] }
 0x44c   : > { %s24_s25 = sadd.s32 1, %s4433_s28  }
 0x44d   : > { %p21_p8 = scmp.ge.s32.totalorder %s24_s25, 4  }
 0x44f   :  { %23 = sbr.rel (!%p21_p8) target bundleno = 1 (0x1), region = 116 }
 0x454   :  { %2543 = vsyncpa [#allocation6], 1 }
 0x455   :  { %2545 = vsyncpa [#allocation6 + $0x1], 1 }

</bundles_post_ra>
